<compile_context>
chip_gen: v5e
topology: v5e:2x2
jax: 0.10.0
libtpu: 0.0.40
codegen_flags: <defaults>
</compile_context>

<pallas_src>
import functools

import jax
import jax.numpy as jnp
from jax.experimental import pallas as pl
from jax.experimental.pallas import tpu as pltpu


def _round_up(a, m):
    return (a + m - 1) // m * m


def _vmem_limit_bytes():
    """Generation-aware VMEM budget (v5e/v6e: 128 MiB phys, v7x: 64 MiB)."""
    cap = 128 * 1024 * 1024
    try:
        cap = int(pltpu.get_tpu_info().vmem_capacity_bytes)
    except Exception:
        pass
    return min(cap * 3 // 4, 100 * 1024 * 1024)


def _conv_bn_silu_kernel(x_hbm, w_ref, b_ref, o_ref, xbuf, sem, *,
                         K, Wp, Lh, half_in, Ltile):
    """One (batch, lane-tile) grid step of conv(KxK, stride 1) + folded-BN bias + SiLU.

    x_hbm : (N, Cin, Lpad)   bf16, raw HBM ref (pl.ANY); zero-padded flattened image,
                             row stride Wp, manually DMA'd with a (K-1)-row halo.
    w_ref : (Cout, K*K*Cin)  bf16 conv weights with BN scale folded, (kh, kw, cin) order.
    b_ref : (Cout, 1)        f32 folded BN bias.
    o_ref : (1, Cout, Ltile) bf16 "wide" output tile (row stride Wp; the Wp-Wo extra
                             columns per row are garbage, dropped / chained outside).
    xbuf  : (2, Cin, half_in) bf16 VMEM scratch, one slot per half-tile.
    sem   : DMA semaphores (2,).
    """
    n = pl.program_id(0)
    t = pl.program_id(1)
    base = t * Ltile

    # Issue both halo DMAs up-front: half 1's copy overlaps half 0's compute.
    copies = []
    for h in range(2):
        start = pl.multiple_of(base + h * Lh, 128)
        cp = pltpu.make_async_copy(
            x_hbm.at[n, :, pl.ds(start, half_in)], xbuf.at[h], sem.at[h])
        cp.start()
        copies.append(cp)

    w = w_ref[...]          # (Cout, K*K*Cin) bf16
    bias = b_ref[...]       # (Cout, 1) f32

    for h in range(2):
        copies[h].wait()
        # im2col: tap (kh, kw) of this half-tile is one contiguous static lane-slice.
        taps = []
        for kh in range(K):
            for kw in range(K):
                off = kh * Wp + kw
                taps.append(xbuf[h, :, off:off + Lh])           # (Cin, Lh) bf16
        col = jnp.concatenate(taps, axis=0)                     # (K*K*Cin, Lh) bf16

        # Single MXU matmul per half (bf16 x bf16 -> f32 accumulate).
        acc = jnp.dot(w, col, preferred_element_type=jnp.float32)   # (Cout, Lh) f32
        y = acc + bias
        # SiLU with a single EUP op: x*sigmoid(x) == 0.5*x*(1 + tanh(x/2)).
        y = y * (0.5 + 0.5 * jnp.tanh(0.5 * y))
        o_ref[0, :, h * Lh:(h + 1) * Lh] = y.astype(o_ref.dtype)


def fold_bn_into_conv(weight_oihw, gamma, beta, running_mean, running_var, eps=1e-5):
    """Fold eval-mode BN into the conv weights (do ONCE at model load, not per call).

    Returns (w2, b2): w2 (Cout, k*k*Cin) bf16 in (kh, kw, cin) column order, b2 (Cout,1) f32.
    """
    Cout, Cin, k, _ = weight_oihw.shape
    scale = gamma.astype(jnp.float32) / jnp.sqrt(running_var.astype(jnp.float32) + eps)
    bias = beta.astype(jnp.float32) - running_mean.astype(jnp.float32) * scale
    w_folded = weight_oihw.astype(jnp.float32) * scale[:, None, None, None]
    w2 = jnp.transpose(w_folded, (0, 2, 3, 1)).reshape(Cout, k * k * Cin)
    return w2.astype(jnp.bfloat16), bias.reshape(Cout, 1)


def _conv_call(x_flat, w2, b2, *, N, Cin, Cout, K, Wp, T, Ltile, Lh, half_in,
               flops, transcendentals, const_single_buffer):
    kkc = K * K * Cin
    if const_single_buffer:
        # Constant blocks: index_map never changes -> one buffer is enough.
        w_spec = pl.BlockSpec((Cout, kkc), lambda n, t: (0, 0),
                              pipeline_mode=pl.Buffered(1))
        b_spec = pl.BlockSpec((Cout, 1), lambda n, t: (0, 0),
                              pipeline_mode=pl.Buffered(1))
    else:
        w_spec = pl.BlockSpec((Cout, kkc), lambda n, t: (0, 0))
        b_spec = pl.BlockSpec((Cout, 1), lambda n, t: (0, 0))

    kernel = functools.partial(_conv_bn_silu_kernel, K=K, Wp=Wp, Lh=Lh,
                               half_in=half_in, Ltile=Ltile)
    bytes_accessed = (x_flat.size * 2 + w2.size * 2 + b2.size * 4
                      + N * Cout * T * Ltile * 2)

    return pl.pallas_call(
        kernel,
        out_shape=jax.ShapeDtypeStruct((N, Cout, T * Ltile), jnp.bfloat16),
        grid_spec=pltpu.PrefetchScalarGridSpec(
            num_scalar_prefetch=0,
            grid=(N, T),
            in_specs=[
                pl.BlockSpec(memory_space=pl.ANY),     # x stays in HBM; manual halo DMA
                w_spec,
                b_spec,
            ],
            out_specs=pl.BlockSpec((1, Cout, Ltile), lambda n, t: (n, 0, t)),
            scratch_shapes=[
                pltpu.VMEM((2, Cin, half_in), jnp.bfloat16),
                pltpu.SemaphoreType.DMA((2,)),
            ],
        ),
        compiler_params=pltpu.CompilerParams(
            dimension_semantics=("parallel", "parallel"),
            vmem_limit_bytes=_vmem_limit_bytes(),
        ),
        cost_estimate=pl.CostEstimate(flops=flops,
                                      transcendentals=transcendentals,
                                      bytes_accessed=bytes_accessed),
    )(x_flat, w2, b2)


def conv_bn_silu(x_nchw, w2, b2, *, k=3, s=1, g=1, d=1, block_lanes=2048):
    """PyTorch-equivalent Conv.forward (conv -> eval BN -> SiLU) with pre-folded weights.

    x_nchw: (N, Cin, H, W) float.  w2/b2 from fold_bn_into_conv().  NCHW in, NCHW out.
    """
    assert s == 1 and g == 1 and d == 1, "only stride=1, groups=1, dilation=1 supported"
    assert k % 2 == 1, "autopad 'same' output requires odd k"
    N, Cin, H, W = x_nchw.shape
    Cout = w2.shape[0]
    assert w2.shape == (Cout, k * k * Cin)

    p = k // 2                                # autopad for d=1
    Hp, Wp = H + 2 * p, W + 2 * p
    Ho, Wo = H, W                             # 'same' output, stride 1
    Lout_wide = Ho * Wp                       # wide/flat output length (row stride Wp)

    # Lane tile (multiple of 256 so each half is a 128-multiple, lane-dense stores).
    Ltile = min(_round_up(block_lanes, 256), _round_up(Lout_wide, 256))
    T = (Lout_wide + Ltile - 1) // Ltile
    Lh = Ltile // 2
    halo = (k - 1) * (Wp + 1)                 # extra input lanes needed per tile
    half_in = Lh + _round_up(halo, 128)       # per-half input slab (128-multiple)
    Lpad = T * Ltile + _round_up(halo, 128)   # flattened input length incl. tail zeros

    # ---- glue (plain JAX): cast to bf16 FIRST, then pad + flatten (single bf16 pass) ----
    xb = x_nchw.astype(jnp.bfloat16)
    x_flat = jnp.pad(xb, ((0, 0), (0, 0), (p, p), (p, p))).reshape(N, Cin, Hp * Wp)
    x_flat = jnp.pad(x_flat, ((0, 0), (0, 0), (0, Lpad - Hp * Wp)))

    flops = 2 * N * Cout * Ho * Wo * k * k * Cin
    transcendentals = N * Cout * Ho * Wo

    call = functools.partial(_conv_call, x_flat, w2, b2,
                             N=N, Cin=Cin, Cout=Cout, K=k, Wp=Wp, T=T, Ltile=Ltile,
                             Lh=Lh, half_in=half_in, flops=flops,
                             transcendentals=transcendentals)
    try:
        out_wide = call(const_single_buffer=True)
    except Exception:
        # Fallback if pipeline_mode=pl.Buffered(1) is rejected by this jax version.
        out_wide = call(const_single_buffer=False)

    # (N, Cout, T*Ltile) wide -> NCHW.  TODO(synk): skip this compaction when chaining layers.
    out = out_wide[:, :, :Lout_wide].reshape(N, Cout, Ho, Wp)[:, :, :, :Wo]
    return out


# ----------------------------- references for testing -----------------------------

def _reference_f32(x, w, gamma, beta, mean, var, *, k, eps=1e-5):
    """Exact f32 semantics of the PyTorch module (conv -> eval BN -> SiLU)."""
    p = k // 2
    y = jax.lax.conv_general_dilated(
        x.astype(jnp.float32), w.astype(jnp.float32),
        window_strides=(1, 1), padding=[(p, p), (p, p)],
        dimension_numbers=("NCHW", "OIHW", "NCHW"),
        precision=jax.lax.Precision.HIGHEST)
    scale = gamma / jnp.sqrt(var + eps)
    bias = beta - mean * scale
    y = y * scale[None, :, None, None] + bias[None, :, None, None]
    return y * jax.nn.sigmoid(y)


def _reference_bf16_quantized(x, w, gamma, beta, mean, var, *, k, eps=1e-5):
    """Same operand quantization as the kernel: bf16 input & BN-folded bf16 weights, f32 accum."""
    p = k // 2
    scale = gamma / jnp.sqrt(var + eps)
    bias = beta - mean * scale
    x_q = x.astype(jnp.bfloat16).astype(jnp.float32)
    w_q = (w.astype(jnp.float32) * scale[:, None, None, None]).astype(jnp.bfloat16).astype(jnp.float32)
    y = jax.lax.conv_general_dilated(
        x_q, w_q, window_strides=(1, 1), padding=[(p, p), (p, p)],
        dimension_numbers=("NCHW", "OIHW", "NCHW"),
        precision=jax.lax.Precision.HIGHEST)
    y = y + bias[None, :, None, None]
    return y * jax.nn.sigmoid(y)


if __name__ == "__main__":
    # Conv(c1=4, c2=8, k=3, s=1) -> autopad p=1, groups=1, dilation=1, act=SiLU
    N, C1, H, W = 2, 4, 16, 16
    C2, K = 8, 3

    key = jax.random.PRNGKey(0)
    k_x, k_w, k_g, k_b, k_m, k_v = jax.random.split(key, 6)

    x = jax.random.normal(k_x, (N, C1, H, W), dtype=jnp.float32)
    weight = jax.random.normal(k_w, (C2, C1, K, K), dtype=jnp.float32) * 0.1     # Conv2d OIHW
    gamma = 1.0 + 0.1 * jax.random.normal(k_g, (C2,), dtype=jnp.float32)         # BN weight
    beta = 0.1 * jax.random.normal(k_b, (C2,), dtype=jnp.float32)                # BN bias
    running_mean = 0.1 * jax.random.normal(k_m, (C2,), dtype=jnp.float32)
    running_var = jnp.abs(jax.random.normal(k_v, (C2,), dtype=jnp.float32)) + 0.5

    # BN fold / weight relayout done once (model-load time), not per forward call.
    w2, b2 = fold_bn_into_conv(weight, gamma, beta, running_mean, running_var)

    # block_lanes=256 so the toy 16x16 map still exercises a multi-tile grid (T=2).
    out = conv_bn_silu(x, w2, b2, k=K, s=1, block_lanes=256)
    out = jax.block_until_ready(out)
    assert out.shape == (N, C2, H, W)
    assert out.dtype == jnp.bfloat16
    out32 = out.astype(jnp.float32)

    # Tight check vs a reference with the same bf16 operand quantization as the kernel
    # (remaining diff: f32 accumulation order + bf16 output rounding + tanh-form SiLU).
    ref_q = _reference_bf16_quantized(x, weight, gamma, beta, running_mean, running_var, k=K)
    assert jnp.allclose(out32, ref_q, atol=2e-2, rtol=2e-2), float(jnp.max(jnp.abs(out32 - ref_q)))

    # Loose check vs exact f32 module semantics (adds bf16 operand rounding).
    ref = _reference_f32(x, weight, gamma, beta, running_mean, running_var, k=K)
    assert jnp.allclose(out32, ref, atol=6e-2, rtol=6e-2), float(jnp.max(jnp.abs(out32 - ref)))

    print("KERNEL_OK")
</pallas_src>

<mosaic_0001>
module attributes {stable_mosaic.version = 11 : i64} {
  func.func @_conv_bn_silu_kernel(%arg0: i32, %arg1: i32, %arg2: memref<2x4x640xbf16, #tpu.memory_space<any>>, %arg3: memref<8x36xbf16, #tpu.memory_space<vmem>>, %arg4: memref<8x1xf32, #tpu.memory_space<vmem>>, %arg5: memref<1x8x256xbf16, #tpu.memory_space<vmem>>, %arg6: memref<2x4x256xbf16, #tpu.memory_space<vmem>>, %arg7: memref<2x!tpu.dma_semaphore, #tpu.memory_space<semaphore_mem>>) attributes {dimension_semantics = [#tpu.dimension_semantics<parallel>, #tpu.dimension_semantics<parallel>], iteration_bounds = array<i64: 2, 2>, scalar_prefetch = 0 : i64, scratch_operands = 2 : i64, tpu.core_type = #tpu.core_type<tc>, window_params = [{}, {pipeline_mode = #tpu.pipeline_mode<synchronous>, transform_indices = @transform_1, window_bounds = array<i64: 8, 36>}, {pipeline_mode = #tpu.pipeline_mode<synchronous>, transform_indices = @transform_2, window_bounds = array<i64: 8, 1>}, {transform_indices = @transform_3, window_bounds = array<i64: 1, 8, 256>}]} {
    %c256_i32 = arith.constant 256 : i32
    %0 = arith.muli %arg1, %c256_i32 : i32
    %c0_i32 = arith.constant 0 : i32
    %1 = arith.addi %0, %c0_i32 : i32
    %2 = tpu.assume_multiple %1, 128 : i32
    %c0_i32_0 = arith.constant 0 : i32
    %c0_i32_1 = arith.constant 0 : i32
    %c0_i32_2 = arith.constant 0 : i32
    %3 = tpu.memref_slice %arg2[%arg0, %c0_i32_2, %2] : memref<2x4x640xbf16, #tpu.memory_space<any>> -> memref<1x4x256xbf16, #tpu.memory_space<any>>
    %4 = tpu.memref_squeeze %3 : memref<1x4x256xbf16, #tpu.memory_space<any>> -> memref<4x256xbf16, #tpu.memory_space<any>>
    %c0_i32_3 = arith.constant 0 : i32
    %c0_i32_4 = arith.constant 0 : i32
    %5 = tpu.memref_slice %arg6[%c0_i32_0, %c0_i32_3, %c0_i32_4] : memref<2x4x256xbf16, #tpu.memory_space<vmem>> -> memref<1x4x256xbf16, #tpu.memory_space<vmem>>
    %6 = tpu.memref_squeeze %5 : memref<1x4x256xbf16, #tpu.memory_space<vmem>> -> memref<4x256xbf16, #tpu.memory_space<vmem>>
    %7 = tpu.memref_slice %arg7[%c0_i32_1] : memref<2x!tpu.dma_semaphore, #tpu.memory_space<semaphore_mem>> -> memref<1x!tpu.dma_semaphore, #tpu.memory_space<semaphore_mem>>
    %8 = tpu.memref_squeeze %7 : memref<1x!tpu.dma_semaphore, #tpu.memory_space<semaphore_mem>> -> memref<!tpu.dma_semaphore, #tpu.memory_space<semaphore_mem>>
    tpu.enqueue_dma source(%4 : memref<4x256xbf16, #tpu.memory_space<any>>) target(%6 : memref<4x256xbf16, #tpu.memory_space<vmem>>) target_semaphore(%8 : memref<!tpu.dma_semaphore, #tpu.memory_space<semaphore_mem>>)
    %c128_i32 = arith.constant 128 : i32
    %9 = arith.addi %0, %c128_i32 : i32
    %10 = tpu.assume_multiple %9, 128 : i32
    %c1_i32 = arith.constant 1 : i32
    %c1_i32_5 = arith.constant 1 : i32
    %c0_i32_6 = arith.constant 0 : i32
    %11 = tpu.memref_slice %arg2[%arg0, %c0_i32_6, %10] : memref<2x4x640xbf16, #tpu.memory_space<any>> -> memref<1x4x256xbf16, #tpu.memory_space<any>>
    %12 = tpu.memref_squeeze %11 : memref<1x4x256xbf16, #tpu.memory_space<any>> -> memref<4x256xbf16, #tpu.memory_space<any>>
    %c0_i32_7 = arith.constant 0 : i32
    %c0_i32_8 = arith.constant 0 : i32
    %13 = tpu.memref_slice %arg6[%c1_i32, %c0_i32_7, %c0_i32_8] : memref<2x4x256xbf16, #tpu.memory_space<vmem>> -> memref<1x4x256xbf16, #tpu.memory_space<vmem>>
    %14 = tpu.memref_squeeze %13 : memref<1x4x256xbf16, #tpu.memory_space<vmem>> -> memref<4x256xbf16, #tpu.memory_space<vmem>>
    %15 = tpu.memref_slice %arg7[%c1_i32_5] : memref<2x!tpu.dma_semaphore, #tpu.memory_space<semaphore_mem>> -> memref<1x!tpu.dma_semaphore, #tpu.memory_space<semaphore_mem>>
    %16 = tpu.memref_squeeze %15 : memref<1x!tpu.dma_semaphore, #tpu.memory_space<semaphore_mem>> -> memref<!tpu.dma_semaphore, #tpu.memory_space<semaphore_mem>>
    tpu.enqueue_dma source(%12 : memref<4x256xbf16, #tpu.memory_space<any>>) target(%14 : memref<4x256xbf16, #tpu.memory_space<vmem>>) target_semaphore(%16 : memref<!tpu.dma_semaphore, #tpu.memory_space<semaphore_mem>>)
    %c0 = arith.constant 0 : index
    %c0_9 = arith.constant 0 : index
    %17 = vector.load %arg3[%c0, %c0_9] : memref<8x36xbf16, #tpu.memory_space<vmem>>, vector<8x36xbf16>
    %c0_10 = arith.constant 0 : index
    %c0_11 = arith.constant 0 : index
    %18 = vector.load %arg4[%c0_10, %c0_11] : memref<8x1xf32, #tpu.memory_space<vmem>>, vector<8x1xf32>
    %c0_i32_12 = arith.constant 0 : i32
    %c0_i32_13 = arith.constant 0 : i32
    %c0_i32_14 = arith.constant 0 : i32
    %19 = tpu.memref_slice %arg2[%arg0, %c0_i32_14, %2] : memref<2x4x640xbf16, #tpu.memory_space<any>> -> memref<1x4x256xbf16, #tpu.memory_space<any>>
    %20 = tpu.memref_squeeze %19 : memref<1x4x256xbf16, #tpu.memory_space<any>> -> memref<4x256xbf16, #tpu.memory_space<any>>
    %c0_i32_15 = arith.constant 0 : i32
    %c0_i32_16 = arith.constant 0 : i32
    %21 = tpu.memref_slice %arg6[%c0_i32_12, %c0_i32_15, %c0_i32_16] : memref<2x4x256xbf16, #tpu.memory_space<vmem>> -> memref<1x4x256xbf16, #tpu.memory_space<vmem>>
    %22 = tpu.memref_squeeze %21 : memref<1x4x256xbf16, #tpu.memory_space<vmem>> -> memref<4x256xbf16, #tpu.memory_space<vmem>>
    %23 = tpu.memref_slice %arg7[%c0_i32_13] : memref<2x!tpu.dma_semaphore, #tpu.memory_space<semaphore_mem>> -> memref<1x!tpu.dma_semaphore, #tpu.memory_space<semaphore_mem>>
    %24 = tpu.memref_squeeze %23 : memref<1x!tpu.dma_semaphore, #tpu.memory_space<semaphore_mem>> -> memref<!tpu.dma_semaphore, #tpu.memory_space<semaphore_mem>>
    tpu.wait_dma2 semaphore(%24 : memref<!tpu.dma_semaphore, #tpu.memory_space<semaphore_mem>>) src(%20 : memref<4x256xbf16, #tpu.memory_space<any>>) dst(%22 : memref<4x256xbf16, #tpu.memory_space<vmem>>)
    %c0_17 = arith.constant 0 : index
    %c0_18 = arith.constant 0 : index
    %c0_19 = arith.constant 0 : index
    %25 = vector.load %arg6[%c0_17, %c0_18, %c0_19] : memref<2x4x256xbf16, #tpu.memory_space<vmem>>, vector<1x4x128xbf16>
    %26 = vector.shape_cast %25 : vector<1x4x128xbf16> to vector<4x128xbf16>
    %c0_20 = arith.constant 0 : index
    %c0_21 = arith.constant 0 : index
    %c1 = arith.constant 1 : index
    %27 = vector.load %arg6[%c0_20, %c0_21, %c1] : memref<2x4x256xbf16, #tpu.memory_space<vmem>>, vector<1x4x128xbf16>
    %28 = vector.shape_cast %27 : vector<1x4x128xbf16> to vector<4x128xbf16>
    %c0_22 = arith.constant 0 : index
    %c0_23 = arith.constant 0 : index
    %c2 = arith.constant 2 : index
    %29 = vector.load %arg6[%c0_22, %c0_23, %c2] : memref<2x4x256xbf16, #tpu.memory_space<vmem>>, vector<1x4x128xbf16>
    %30 = vector.shape_cast %29 : vector<1x4x128xbf16> to vector<4x128xbf16>
    %c0_24 = arith.constant 0 : index
    %c0_25 = arith.constant 0 : index
    %c18 = arith.constant 18 : index
    %31 = vector.load %arg6[%c0_24, %c0_25, %c18] : memref<2x4x256xbf16, #tpu.memory_space<vmem>>, vector<1x4x128xbf16>
    %32 = vector.shape_cast %31 : vector<1x4x128xbf16> to vector<4x128xbf16>
    %c0_26 = arith.constant 0 : index
    %c0_27 = arith.constant 0 : index
    %c19 = arith.constant 19 : index
    %33 = vector.load %arg6[%c0_26, %c0_27, %c19] : memref<2x4x256xbf16, #tpu.memory_space<vmem>>, vector<1x4x128xbf16>
    %34 = vector.shape_cast %33 : vector<1x4x128xbf16> to vector<4x128xbf16>
    %c0_28 = arith.constant 0 : index
    %c0_29 = arith.constant 0 : index
    %c20 = arith.constant 20 : index
    %35 = vector.load %arg6[%c0_28, %c0_29, %c20] : memref<2x4x256xbf16, #tpu.memory_space<vmem>>, vector<1x4x128xbf16>
    %36 = vector.shape_cast %35 : vector<1x4x128xbf16> to vector<4x128xbf16>
    %c0_30 = arith.constant 0 : index
    %c0_31 = arith.constant 0 : index
    %c36 = arith.constant 36 : index
    %37 = vector.load %arg6[%c0_30, %c0_31, %c36] : memref<2x4x256xbf16, #tpu.memory_space<vmem>>, vector<1x4x128xbf16>
    %38 = vector.shape_cast %37 : vector<1x4x128xbf16> to vector<4x128xbf16>
    %c0_32 = arith.constant 0 : index
    %c0_33 = arith.constant 0 : index
    %c37 = arith.constant 37 : index
    %39 = vector.load %arg6[%c0_32, %c0_33, %c37] : memref<2x4x256xbf16, #tpu.memory_space<vmem>>, vector<1x4x128xbf16>
    %40 = vector.shape_cast %39 : vector<1x4x128xbf16> to vector<4x128xbf16>
    %c0_34 = arith.constant 0 : index
    %c0_35 = arith.constant 0 : index
    %c38 = arith.constant 38 : index
    %41 = vector.load %arg6[%c0_34, %c0_35, %c38] : memref<2x4x256xbf16, #tpu.memory_space<vmem>>, vector<1x4x128xbf16>
    %42 = vector.shape_cast %41 : vector<1x4x128xbf16> to vector<4x128xbf16>
    %43 = tpu.concatenate %26, %28, %30, %32, %34, %36, %38, %40, %42 in 0 : vector<4x128xbf16>, vector<4x128xbf16>, vector<4x128xbf16>, vector<4x128xbf16>, vector<4x128xbf16>, vector<4x128xbf16>, vector<4x128xbf16>, vector<4x128xbf16>, vector<4x128xbf16> -> vector<36x128xbf16>
    %cst = arith.constant dense<0.000000e+00> : vector<8x128xf32>
    %44 = tpu.matmul %17, %43, %cst {dimension_numbers = #tpu.dot_dimension_numbers<[1], [0], [0], [1], [0, 0, 1, 1], [], []>} : vector<8x36xbf16>, vector<36x128xbf16>, vector<8x128xf32> -> vector<8x128xf32>
    %45 = vector.broadcast %18 : vector<8x1xf32> to vector<8x128xf32>
    %46 = arith.addf %44, %45 : vector<8x128xf32>
    %cst_36 = arith.constant 5.000000e-01 : f32
    %47 = vector.broadcast %cst_36 : f32 to vector<8x128xf32>
    %48 = arith.mulf %47, %46 : vector<8x128xf32>
    %49 = math.tanh %48 : vector<8x128xf32>
    %cst_37 = arith.constant 5.000000e-01 : f32
    %50 = vector.broadcast %cst_37 : f32 to vector<8x128xf32>
    %51 = arith.mulf %50, %49 : vector<8x128xf32>
    %cst_38 = arith.constant 5.000000e-01 : f32
    %52 = vector.broadcast %cst_38 : f32 to vector<8x128xf32>
    %53 = arith.addf %52, %51 : vector<8x128xf32>
    %54 = arith.mulf %46, %53 : vector<8x128xf32>
    %55 = arith.truncf %54 : vector<8x128xf32> to vector<8x128xbf16>
    %c0_39 = arith.constant 0 : index
    %c0_40 = arith.constant 0 : index
    %c0_41 = arith.constant 0 : index
    %56 = vector.load %arg5[%c0_39, %c0_40, %c0_41] : memref<1x8x256xbf16, #tpu.memory_space<vmem>>, vector<1x8x128xbf16>
    %57 = vector.shape_cast %56 : vector<1x8x128xbf16> to vector<8x128xbf16>
    %58 = vector.shape_cast %55 : vector<8x128xbf16> to vector<1x8x128xbf16>
    tpu.vector_store %arg5[%c0_39, %c0_40, %c0_41], %58 {strides = array<i32>} : memref<1x8x256xbf16, #tpu.memory_space<vmem>>, vector<1x8x128xbf16>,
    %c1_i32_42 = arith.constant 1 : i32
    %c1_i32_43 = arith.constant 1 : i32
    %c0_i32_44 = arith.constant 0 : i32
    %59 = tpu.memref_slice %arg2[%arg0, %c0_i32_44, %10] : memref<2x4x640xbf16, #tpu.memory_space<any>> -> memref<1x4x256xbf16, #tpu.memory_space<any>>
    %60 = tpu.memref_squeeze %59 : memref<1x4x256xbf16, #tpu.memory_space<any>> -> memref<4x256xbf16, #tpu.memory_space<any>>
    %c0_i32_45 = arith.constant 0 : i32
    %c0_i32_46 = arith.constant 0 : i32
    %61 = tpu.memref_slice %arg6[%c1_i32_42, %c0_i32_45, %c0_i32_46] : memref<2x4x256xbf16, #tpu.memory_space<vmem>> -> memref<1x4x256xbf16, #tpu.memory_space<vmem>>
    %62 = tpu.memref_squeeze %61 : memref<1x4x256xbf16, #tpu.memory_space<vmem>> -> memref<4x256xbf16, #tpu.memory_space<vmem>>
    %63 = tpu.memref_slice %arg7[%c1_i32_43] : memref<2x!tpu.dma_semaphore, #tpu.memory_space<semaphore_mem>> -> memref<1x!tpu.dma_semaphore, #tpu.memory_space<semaphore_mem>>
    %64 = tpu.memref_squeeze %63 : memref<1x!tpu.dma_semaphore, #tpu.memory_space<semaphore_mem>> -> memref<!tpu.dma_semaphore, #tpu.memory_space<semaphore_mem>>
    tpu.wait_dma2 semaphore(%64 : memref<!tpu.dma_semaphore, #tpu.memory_space<semaphore_mem>>) src(%60 : memref<4x256xbf16, #tpu.memory_space<any>>) dst(%62 : memref<4x256xbf16, #tpu.memory_space<vmem>>)
    %c1_47 = arith.constant 1 : index
    %c0_48 = arith.constant 0 : index
    %c0_49 = arith.constant 0 : index
    %65 = vector.load %arg6[%c1_47, %c0_48, %c0_49] : memref<2x4x256xbf16, #tpu.memory_space<vmem>>, vector<1x4x128xbf16>
    %66 = vector.shape_cast %65 : vector<1x4x128xbf16> to vector<4x128xbf16>
    %c1_50 = arith.constant 1 : index
    %c0_51 = arith.constant 0 : index
    %c1_52 = arith.constant 1 : index
    %67 = vector.load %arg6[%c1_50, %c0_51, %c1_52] : memref<2x4x256xbf16, #tpu.memory_space<vmem>>, vector<1x4x128xbf16>
    %68 = vector.shape_cast %67 : vector<1x4x128xbf16> to vector<4x128xbf16>
    %c1_53 = arith.constant 1 : index
    %c0_54 = arith.constant 0 : index
    %c2_55 = arith.constant 2 : index
    %69 = vector.load %arg6[%c1_53, %c0_54, %c2_55] : memref<2x4x256xbf16, #tpu.memory_space<vmem>>, vector<1x4x128xbf16>
    %70 = vector.shape_cast %69 : vector<1x4x128xbf16> to vector<4x128xbf16>
    %c1_56 = arith.constant 1 : index
    %c0_57 = arith.constant 0 : index
    %c18_58 = arith.constant 18 : index
    %71 = vector.load %arg6[%c1_56, %c0_57, %c18_58] : memref<2x4x256xbf16, #tpu.memory_space<vmem>>, vector<1x4x128xbf16>
    %72 = vector.shape_cast %71 : vector<1x4x128xbf16> to vector<4x128xbf16>
    %c1_59 = arith.constant 1 : index
    %c0_60 = arith.constant 0 : index
    %c19_61 = arith.constant 19 : index
    %73 = vector.load %arg6[%c1_59, %c0_60, %c19_61] : memref<2x4x256xbf16, #tpu.memory_space<vmem>>, vector<1x4x128xbf16>
    %74 = vector.shape_cast %73 : vector<1x4x128xbf16> to vector<4x128xbf16>
    %c1_62 = arith.constant 1 : index
    %c0_63 = arith.constant 0 : index
    %c20_64 = arith.constant 20 : index
    %75 = vector.load %arg6[%c1_62, %c0_63, %c20_64] : memref<2x4x256xbf16, #tpu.memory_space<vmem>>, vector<1x4x128xbf16>
    %76 = vector.shape_cast %75 : vector<1x4x128xbf16> to vector<4x128xbf16>
    %c1_65 = arith.constant 1 : index
    %c0_66 = arith.constant 0 : index
    %c36_67 = arith.constant 36 : index
    %77 = vector.load %arg6[%c1_65, %c0_66, %c36_67] : memref<2x4x256xbf16, #tpu.memory_space<vmem>>, vector<1x4x128xbf16>
    %78 = vector.shape_cast %77 : vector<1x4x128xbf16> to vector<4x128xbf16>
    %c1_68 = arith.constant 1 : index
    %c0_69 = arith.constant 0 : index
    %c37_70 = arith.constant 37 : index
    %79 = vector.load %arg6[%c1_68, %c0_69, %c37_70] : memref<2x4x256xbf16, #tpu.memory_space<vmem>>, vector<1x4x128xbf16>
    %80 = vector.shape_cast %79 : vector<1x4x128xbf16> to vector<4x128xbf16>
    %c1_71 = arith.constant 1 : index
    %c0_72 = arith.constant 0 : index
    %c38_73 = arith.constant 38 : index
    %81 = vector.load %arg6[%c1_71, %c0_72, %c38_73] : memref<2x4x256xbf16, #tpu.memory_space<vmem>>, vector<1x4x128xbf16>
    %82 = vector.shape_cast %81 : vector<1x4x128xbf16> to vector<4x128xbf16>
    %83 = tpu.concatenate %66, %68, %70, %72, %74, %76, %78, %80, %82 in 0 : vector<4x128xbf16>, vector<4x128xbf16>, vector<4x128xbf16>, vector<4x128xbf16>, vector<4x128xbf16>, vector<4x128xbf16>, vector<4x128xbf16>, vector<4x128xbf16>, vector<4x128xbf16> -> vector<36x128xbf16>
    %cst_74 = arith.constant dense<0.000000e+00> : vector<8x128xf32>
    %84 = tpu.matmul %17, %83, %cst_74 {dimension_numbers = #tpu.dot_dimension_numbers<[1], [0], [0], [1], [0, 0, 1, 1], [], []>} : vector<8x36xbf16>, vector<36x128xbf16>, vector<8x128xf32> -> vector<8x128xf32>
    %85 = vector.broadcast %18 : vector<8x1xf32> to vector<8x128xf32>
    %86 = arith.addf %84, %85 : vector<8x128xf32>
    %cst_75 = arith.constant 5.000000e-01 : f32
    %87 = vector.broadcast %cst_75 : f32 to vector<8x128xf32>
    %88 = arith.mulf %87, %86 : vector<8x128xf32>
    %89 = math.tanh %88 : vector<8x128xf32>
    %cst_76 = arith.constant 5.000000e-01 : f32
    %90 = vector.broadcast %cst_76 : f32 to vector<8x128xf32>
    %91 = arith.mulf %90, %89 : vector<8x128xf32>
    %cst_77 = arith.constant 5.000000e-01 : f32
    %92 = vector.broadcast %cst_77 : f32 to vector<8x128xf32>
    %93 = arith.addf %92, %91 : vector<8x128xf32>
    %94 = arith.mulf %86, %93 : vector<8x128xf32>
    %95 = arith.truncf %94 : vector<8x128xf32> to vector<8x128xbf16>
    %c0_78 = arith.constant 0 : index
    %c0_79 = arith.constant 0 : index
    %c128 = arith.constant 128 : index
    %96 = vector.load %arg5[%c0_78, %c0_79, %c128] : memref<1x8x256xbf16, #tpu.memory_space<vmem>>, vector<1x8x128xbf16>
    %97 = vector.shape_cast %96 : vector<1x8x128xbf16> to vector<8x128xbf16>
    %98 = vector.shape_cast %95 : vector<8x128xbf16> to vector<1x8x128xbf16>
    tpu.vector_store %arg5[%c0_78, %c0_79, %c128], %98 {strides = array<i32>} : memref<1x8x256xbf16, #tpu.memory_space<vmem>>, vector<1x8x128xbf16>,
    return
  }
  func.func @transform_1(%arg0: i32, %arg1: i32) -> (i32, i32) {
    %c0_i32 = arith.constant 0 : i32
    %c0_i32_0 = arith.constant 0 : i32
    %c0_i32_1 = arith.constant 0 : i32
    return %c0_i32, %c0_i32_0 : i32, i32
  }
  func.func @transform_2(%arg0: i32, %arg1: i32) -> (i32, i32) {
    %c0_i32 = arith.constant 0 : i32
    %c0_i32_0 = arith.constant 0 : i32
    %c0_i32_1 = arith.constant 0 : i32
    return %c0_i32, %c0_i32_0 : i32, i32
  }
  func.func @transform_3(%arg0: i32, %arg1: i32) -> (i32, i32, i32) {
    %c0_i32 = arith.constant 0 : i32
    %c0_i32_0 = arith.constant 0 : i32
    return %arg0, %c0_i32, %arg1 : i32, i32, i32
  }
}

module attributes {stable_mosaic.version = 11 : i64} {
  func.func @_conv_bn_silu_kernel(%arg0: i32, %arg1: i32, %arg2: memref<2x4x640xbf16, #tpu.memory_space<any>>, %arg3: memref<8x36xbf16, #tpu.memory_space<vmem>>, %arg4: memref<8x1xf32, #tpu.memory_space<vmem>>, %arg5: memref<1x8x256xbf16, #tpu.memory_space<vmem>>, %arg6: memref<2x4x256xbf16, #tpu.memory_space<vmem>>, %arg7: memref<2x!tpu.dma_semaphore, #tpu.memory_space<semaphore_mem>>) attributes {dimension_semantics = [#tpu.dimension_semantics<parallel>, #tpu.dimension_semantics<parallel>], iteration_bounds = array<i64: 2, 2>, scalar_prefetch = 0 : i64, scratch_operands = 2 : i64, tpu.core_type = #tpu.core_type<tc>, window_params = [{}, {pipeline_mode = #tpu.pipeline_mode<synchronous>, transform_indices = @transform_1, window_bounds = array<i64: 8, 36>}, {pipeline_mode = #tpu.pipeline_mode<synchronous>, transform_indices = @transform_2, window_bounds = array<i64: 8, 1>}, {transform_indices = @transform_3, window_bounds = array<i64: 1, 8, 256>}]} {
    %c256_i32 = arith.constant 256 : i32
    %0 = arith.muli %arg1, %c256_i32 : i32
    %c0_i32 = arith.constant 0 : i32
    %1 = arith.addi %0, %c0_i32 : i32
    %2 = tpu.assume_multiple %1, 128 : i32
    %c0_i32_0 = arith.constant 0 : i32
    %c0_i32_1 = arith.constant 0 : i32
    %c0_i32_2 = arith.constant 0 : i32
    %3 = tpu.memref_slice %arg2[%arg0, %c0_i32_2, %2] : memref<2x4x640xbf16, #tpu.memory_space<any>> -> memref<1x4x256xbf16, #tpu.memory_space<any>>
    %4 = tpu.memref_squeeze %3 : memref<1x4x256xbf16, #tpu.memory_space<any>> -> memref<4x256xbf16, #tpu.memory_space<any>>
    %c0_i32_3 = arith.constant 0 : i32
    %c0_i32_4 = arith.constant 0 : i32
    %5 = tpu.memref_slice %arg6[%c0_i32_0, %c0_i32_3, %c0_i32_4] : memref<2x4x256xbf16, #tpu.memory_space<vmem>> -> memref<1x4x256xbf16, #tpu.memory_space<vmem>>
    %6 = tpu.memref_squeeze %5 : memref<1x4x256xbf16, #tpu.memory_space<vmem>> -> memref<4x256xbf16, #tpu.memory_space<vmem>>
    %7 = tpu.memref_slice %arg7[%c0_i32_1] : memref<2x!tpu.dma_semaphore, #tpu.memory_space<semaphore_mem>> -> memref<1x!tpu.dma_semaphore, #tpu.memory_space<semaphore_mem>>
    %8 = tpu.memref_squeeze %7 : memref<1x!tpu.dma_semaphore, #tpu.memory_space<semaphore_mem>> -> memref<!tpu.dma_semaphore, #tpu.memory_space<semaphore_mem>>
    tpu.enqueue_dma source(%4 : memref<4x256xbf16, #tpu.memory_space<any>>) target(%6 : memref<4x256xbf16, #tpu.memory_space<vmem>>) target_semaphore(%8 : memref<!tpu.dma_semaphore, #tpu.memory_space<semaphore_mem>>)
    %c128_i32 = arith.constant 128 : i32
    %9 = arith.addi %0, %c128_i32 : i32
    %10 = tpu.assume_multiple %9, 128 : i32
    %c1_i32 = arith.constant 1 : i32
    %c1_i32_5 = arith.constant 1 : i32
    %c0_i32_6 = arith.constant 0 : i32
    %11 = tpu.memref_slice %arg2[%arg0, %c0_i32_6, %10] : memref<2x4x640xbf16, #tpu.memory_space<any>> -> memref<1x4x256xbf16, #tpu.memory_space<any>>
    %12 = tpu.memref_squeeze %11 : memref<1x4x256xbf16, #tpu.memory_space<any>> -> memref<4x256xbf16, #tpu.memory_space<any>>
    %c0_i32_7 = arith.constant 0 : i32
    %c0_i32_8 = arith.constant 0 : i32
    %13 = tpu.memref_slice %arg6[%c1_i32, %c0_i32_7, %c0_i32_8] : memref<2x4x256xbf16, #tpu.memory_space<vmem>> -> memref<1x4x256xbf16, #tpu.memory_space<vmem>>
    %14 = tpu.memref_squeeze %13 : memref<1x4x256xbf16, #tpu.memory_space<vmem>> -> memref<4x256xbf16, #tpu.memory_space<vmem>>
    %15 = tpu.memref_slice %arg7[%c1_i32_5] : memref<2x!tpu.dma_semaphore, #tpu.memory_space<semaphore_mem>> -> memref<1x!tpu.dma_semaphore, #tpu.memory_space<semaphore_mem>>
    %16 = tpu.memref_squeeze %15 : memref<1x!tpu.dma_semaphore, #tpu.memory_space<semaphore_mem>> -> memref<!tpu.dma_semaphore, #tpu.memory_space<semaphore_mem>>
    tpu.enqueue_dma source(%12 : memref<4x256xbf16, #tpu.memory_space<any>>) target(%14 : memref<4x256xbf16, #tpu.memory_space<vmem>>) target_semaphore(%16 : memref<!tpu.dma_semaphore, #tpu.memory_space<semaphore_mem>>)
    %c0 = arith.constant 0 : index
    %c0_9 = arith.constant 0 : index
    %17 = vector.load %arg3[%c0, %c0_9] : memref<8x36xbf16, #tpu.memory_space<vmem>>, vector<8x36xbf16>
    %c0_10 = arith.constant 0 : index
    %c0_11 = arith.constant 0 : index
    %18 = vector.load %arg4[%c0_10, %c0_11] : memref<8x1xf32, #tpu.memory_space<vmem>>, vector<8x1xf32>
    %c0_i32_12 = arith.constant 0 : i32
    %c0_i32_13 = arith.constant 0 : i32
    %c0_i32_14 = arith.constant 0 : i32
    %19 = tpu.memref_slice %arg2[%arg0, %c0_i32_14, %2] : memref<2x4x640xbf16, #tpu.memory_space<any>> -> memref<1x4x256xbf16, #tpu.memory_space<any>>
    %20 = tpu.memref_squeeze %19 : memref<1x4x256xbf16, #tpu.memory_space<any>> -> memref<4x256xbf16, #tpu.memory_space<any>>
    %c0_i32_15 = arith.constant 0 : i32
    %c0_i32_16 = arith.constant 0 : i32
    %21 = tpu.memref_slice %arg6[%c0_i32_12, %c0_i32_15, %c0_i32_16] : memref<2x4x256xbf16, #tpu.memory_space<vmem>> -> memref<1x4x256xbf16, #tpu.memory_space<vmem>>
    %22 = tpu.memref_squeeze %21 : memref<1x4x256xbf16, #tpu.memory_space<vmem>> -> memref<4x256xbf16, #tpu.memory_space<vmem>>
    %23 = tpu.memref_slice %arg7[%c0_i32_13] : memref<2x!tpu.dma_semaphore, #tpu.memory_space<semaphore_mem>> -> memref<1x!tpu.dma_semaphore, #tpu.memory_space<semaphore_mem>>
    %24 = tpu.memref_squeeze %23 : memref<1x!tpu.dma_semaphore, #tpu.memory_space<semaphore_mem>> -> memref<!tpu.dma_semaphore, #tpu.memory_space<semaphore_mem>>
    tpu.wait_dma2 semaphore(%24 : memref<!tpu.dma_semaphore, #tpu.memory_space<semaphore_mem>>) src(%20 : memref<4x256xbf16, #tpu.memory_space<any>>) dst(%22 : memref<4x256xbf16, #tpu.memory_space<vmem>>)
    %c0_17 = arith.constant 0 : index
    %c0_18 = arith.constant 0 : index
    %c0_19 = arith.constant 0 : index
    %25 = vector.load %arg6[%c0_17, %c0_18, %c0_19] : memref<2x4x256xbf16, #tpu.memory_space<vmem>>, vector<1x4x128xbf16>
    %26 = vector.shape_cast %25 : vector<1x4x128xbf16> to vector<4x128xbf16>
    %c0_20 = arith.constant 0 : index
    %c0_21 = arith.constant 0 : index
    %c1 = arith.constant 1 : index
    %27 = vector.load %arg6[%c0_20, %c0_21, %c1] : memref<2x4x256xbf16, #tpu.memory_space<vmem>>, vector<1x4x128xbf16>
    %28 = vector.shape_cast %27 : vector<1x4x128xbf16> to vector<4x128xbf16>
    %c0_22 = arith.constant 0 : index
    %c0_23 = arith.constant 0 : index
    %c2 = arith.constant 2 : index
    %29 = vector.load %arg6[%c0_22, %c0_23, %c2] : memref<2x4x256xbf16, #tpu.memory_space<vmem>>, vector<1x4x128xbf16>
    %30 = vector.shape_cast %29 : vector<1x4x128xbf16> to vector<4x128xbf16>
    %c0_24 = arith.constant 0 : index
    %c0_25 = arith.constant 0 : index
    %c18 = arith.constant 18 : index
    %31 = vector.load %arg6[%c0_24, %c0_25, %c18] : memref<2x4x256xbf16, #tpu.memory_space<vmem>>, vector<1x4x128xbf16>
    %32 = vector.shape_cast %31 : vector<1x4x128xbf16> to vector<4x128xbf16>
    %c0_26 = arith.constant 0 : index
    %c0_27 = arith.constant 0 : index
    %c19 = arith.constant 19 : index
    %33 = vector.load %arg6[%c0_26, %c0_27, %c19] : memref<2x4x256xbf16, #tpu.memory_space<vmem>>, vector<1x4x128xbf16>
    %34 = vector.shape_cast %33 : vector<1x4x128xbf16> to vector<4x128xbf16>
    %c0_28 = arith.constant 0 : index
    %c0_29 = arith.constant 0 : index
    %c20 = arith.constant 20 : index
    %35 = vector.load %arg6[%c0_28, %c0_29, %c20] : memref<2x4x256xbf16, #tpu.memory_space<vmem>>, vector<1x4x128xbf16>
    %36 = vector.shape_cast %35 : vector<1x4x128xbf16> to vector<4x128xbf16>
    %c0_30 = arith.constant 0 : index
    %c0_31 = arith.constant 0 : index
    %c36 = arith.constant 36 : index
    %37 = vector.load %arg6[%c0_30, %c0_31, %c36] : memref<2x4x256xbf16, #tpu.memory_space<vmem>>, vector<1x4x128xbf16>
    %38 = vector.shape_cast %37 : vector<1x4x128xbf16> to vector<4x128xbf16>
    %c0_32 = arith.constant 0 : index
    %c0_33 = arith.constant 0 : index
    %c37 = arith.constant 37 : index
    %39 = vector.load %arg6[%c0_32, %c0_33, %c37] : memref<2x4x256xbf16, #tpu.memory_space<vmem>>, vector<1x4x128xbf16>
    %40 = vector.shape_cast %39 : vector<1x4x128xbf16> to vector<4x128xbf16>
    %c0_34 = arith.constant 0 : index
    %c0_35 = arith.constant 0 : index
    %c38 = arith.constant 38 : index
    %41 = vector.load %arg6[%c0_34, %c0_35, %c38] : memref<2x4x256xbf16, #tpu.memory_space<vmem>>, vector<1x4x128xbf16>
    %42 = vector.shape_cast %41 : vector<1x4x128xbf16> to vector<4x128xbf16>
    %43 = tpu.concatenate %26, %28, %30, %32, %34, %36, %38, %40, %42 in 0 : vector<4x128xbf16>, vector<4x128xbf16>, vector<4x128xbf16>, vector<4x128xbf16>, vector<4x128xbf16>, vector<4x128xbf16>, vector<4x128xbf16>, vector<4x128xbf16>, vector<4x128xbf16> -> vector<36x128xbf16>
    %cst = arith.constant dense<0.000000e+00> : vector<8x128xf32>
    %44 = tpu.matmul %17, %43, %cst {dimension_numbers = #tpu.dot_dimension_numbers<[1], [0], [0], [1], [0, 0, 1, 1], [], []>} : vector<8x36xbf16>, vector<36x128xbf16>, vector<8x128xf32> -> vector<8x128xf32>
    %45 = vector.broadcast %18 : vector<8x1xf32> to vector<8x128xf32>
    %46 = arith.addf %44, %45 : vector<8x128xf32>
    %cst_36 = arith.constant 5.000000e-01 : f32
    %47 = vector.broadcast %cst_36 : f32 to vector<8x128xf32>
    %48 = arith.mulf %47, %46 : vector<8x128xf32>
    %49 = math.tanh %48 : vector<8x128xf32>
    %cst_37 = arith.constant 5.000000e-01 : f32
    %50 = vector.broadcast %cst_37 : f32 to vector<8x128xf32>
    %51 = arith.mulf %50, %49 : vector<8x128xf32>
    %cst_38 = arith.constant 5.000000e-01 : f32
    %52 = vector.broadcast %cst_38 : f32 to vector<8x128xf32>
    %53 = arith.addf %52, %51 : vector<8x128xf32>
    %54 = arith.mulf %46, %53 : vector<8x128xf32>
    %55 = arith.truncf %54 : vector<8x128xf32> to vector<8x128xbf16>
    %c0_39 = arith.constant 0 : index
    %c0_40 = arith.constant 0 : index
    %c0_41 = arith.constant 0 : index
    %56 = vector.load %arg5[%c0_39, %c0_40, %c0_41] : memref<1x8x256xbf16, #tpu.memory_space<vmem>>, vector<1x8x128xbf16>
    %57 = vector.shape_cast %56 : vector<1x8x128xbf16> to vector<8x128xbf16>
    %58 = vector.shape_cast %55 : vector<8x128xbf16> to vector<1x8x128xbf16>
    tpu.vector_store %arg5[%c0_39, %c0_40, %c0_41], %58 {strides = array<i32>} : memref<1x8x256xbf16, #tpu.memory_space<vmem>>, vector<1x8x128xbf16>,
    %c1_i32_42 = arith.constant 1 : i32
    %c1_i32_43 = arith.constant 1 : i32
    %c0_i32_44 = arith.constant 0 : i32
    %59 = tpu.memref_slice %arg2[%arg0, %c0_i32_44, %10] : memref<2x4x640xbf16, #tpu.memory_space<any>> -> memref<1x4x256xbf16, #tpu.memory_space<any>>
    %60 = tpu.memref_squeeze %59 : memref<1x4x256xbf16, #tpu.memory_space<any>> -> memref<4x256xbf16, #tpu.memory_space<any>>
    %c0_i32_45 = arith.constant 0 : i32
    %c0_i32_46 = arith.constant 0 : i32
    %61 = tpu.memref_slice %arg6[%c1_i32_42, %c0_i32_45, %c0_i32_46] : memref<2x4x256xbf16, #tpu.memory_space<vmem>> -> memref<1x4x256xbf16, #tpu.memory_space<vmem>>
    %62 = tpu.memref_squeeze %61 : memref<1x4x256xbf16, #tpu.memory_space<vmem>> -> memref<4x256xbf16, #tpu.memory_space<vmem>>
    %63 = tpu.memref_slice %arg7[%c1_i32_43] : memref<2x!tpu.dma_semaphore, #tpu.memory_space<semaphore_mem>> -> memref<1x!tpu.dma_semaphore, #tpu.memory_space<semaphore_mem>>
    %64 = tpu.memref_squeeze %63 : memref<1x!tpu.dma_semaphore, #tpu.memory_space<semaphore_mem>> -> memref<!tpu.dma_semaphore, #tpu.memory_space<semaphore_mem>>
    tpu.wait_dma2 semaphore(%64 : memref<!tpu.dma_semaphore, #tpu.memory_space<semaphore_mem>>) src(%60 : memref<4x256xbf16, #tpu.memory_space<any>>) dst(%62 : memref<4x256xbf16, #tpu.memory_space<vmem>>)
    %c1_47 = arith.constant 1 : index
    %c0_48 = arith.constant 0 : index
    %c0_49 = arith.constant 0 : index
    %65 = vector.load %arg6[%c1_47, %c0_48, %c0_49] : memref<2x4x256xbf16, #tpu.memory_space<vmem>>, vector<1x4x128xbf16>
    %66 = vector.shape_cast %65 : vector<1x4x128xbf16> to vector<4x128xbf16>
    %c1_50 = arith.constant 1 : index
    %c0_51 = arith.constant 0 : index
    %c1_52 = arith.constant 1 : index
    %67 = vector.load %arg6[%c1_50, %c0_51, %c1_52] : memref<2x4x256xbf16, #tpu.memory_space<vmem>>, vector<1x4x128xbf16>
    %68 = vector.shape_cast %67 : vector<1x4x128xbf16> to vector<4x128xbf16>
    %c1_53 = arith.constant 1 : index
    %c0_54 = arith.constant 0 : index
    %c2_55 = arith.constant 2 : index
    %69 = vector.load %arg6[%c1_53, %c0_54, %c2_55] : memref<2x4x256xbf16, #tpu.memory_space<vmem>>, vector<1x4x128xbf16>
    %70 = vector.shape_cast %69 : vector<1x4x128xbf16> to vector<4x128xbf16>
    %c1_56 = arith.constant 1 : index
    %c0_57 = arith.constant 0 : index
    %c18_58 = arith.constant 18 : index
    %71 = vector.load %arg6[%c1_56, %c0_57, %c18_58] : memref<2x4x256xbf16, #tpu.memory_space<vmem>>, vector<1x4x128xbf16>
    %72 = vector.shape_cast %71 : vector<1x4x128xbf16> to vector<4x128xbf16>
    %c1_59 = arith.constant 1 : index
    %c0_60 = arith.constant 0 : index
    %c19_61 = arith.constant 19 : index
    %73 = vector.load %arg6[%c1_59, %c0_60, %c19_61] : memref<2x4x256xbf16, #tpu.memory_space<vmem>>, vector<1x4x128xbf16>
    %74 = vector.shape_cast %73 : vector<1x4x128xbf16> to vector<4x128xbf16>
    %c1_62 = arith.constant 1 : index
    %c0_63 = arith.constant 0 : index
    %c20_64 = arith.constant 20 : index
    %75 = vector.load %arg6[%c1_62, %c0_63, %c20_64] : memref<2x4x256xbf16, #tpu.memory_space<vmem>>, vector<1x4x128xbf16>
    %76 = vector.shape_cast %75 : vector<1x4x128xbf16> to vector<4x128xbf16>
    %c1_65 = arith.constant 1 : index
    %c0_66 = arith.constant 0 : index
    %c36_67 = arith.constant 36 : index
    %77 = vector.load %arg6[%c1_65, %c0_66, %c36_67] : memref<2x4x256xbf16, #tpu.memory_space<vmem>>, vector<1x4x128xbf16>
    %78 = vector.shape_cast %77 : vector<1x4x128xbf16> to vector<4x128xbf16>
    %c1_68 = arith.constant 1 : index
    %c0_69 = arith.constant 0 : index
    %c37_70 = arith.constant 37 : index
    %79 = vector.load %arg6[%c1_68, %c0_69, %c37_70] : memref<2x4x256xbf16, #tpu.memory_space<vmem>>, vector<1x4x128xbf16>
    %80 = vector.shape_cast %79 : vector<1x4x128xbf16> to vector<4x128xbf16>
    %c1_71 = arith.constant 1 : index
    %c0_72 = arith.constant 0 : index
    %c38_73 = arith.constant 38 : index
    %81 = vector.load %arg6[%c1_71, %c0_72, %c38_73] : memref<2x4x256xbf16, #tpu.memory_space<vmem>>, vector<1x4x128xbf16>
    %82 = vector.shape_cast %81 : vector<1x4x128xbf16> to vector<4x128xbf16>
    %83 = tpu.concatenate %66, %68, %70, %72, %74, %76, %78, %80, %82 in 0 : vector<4x128xbf16>, vector<4x128xbf16>, vector<4x128xbf16>, vector<4x128xbf16>, vector<4x128xbf16>, vector<4x128xbf16>, vector<4x128xbf16>, vector<4x128xbf16>, vector<4x128xbf16> -> vector<36x128xbf16>
    %cst_74 = arith.constant dense<0.000000e+00> : vector<8x128xf32>
    %84 = tpu.matmul %17, %83, %cst_74 {dimension_numbers = #tpu.dot_dimension_numbers<[1], [0], [0], [1], [0, 0, 1, 1], [], []>} : vector<8x36xbf16>, vector<36x128xbf16>, vector<8x128xf32> -> vector<8x128xf32>
    %85 = vector.broadcast %18 : vector<8x1xf32> to vector<8x128xf32>
    %86 = arith.addf %84, %85 : vector<8x128xf32>
    %cst_75 = arith.constant 5.000000e-01 : f32
    %87 = vector.broadcast %cst_75 : f32 to vector<8x128xf32>
    %88 = arith.mulf %87, %86 : vector<8x128xf32>
    %89 = math.tanh %88 : vector<8x128xf32>
    %cst_76 = arith.constant 5.000000e-01 : f32
    %90 = vector.broadcast %cst_76 : f32 to vector<8x128xf32>
    %91 = arith.mulf %90, %89 : vector<8x128xf32>
    %cst_77 = arith.constant 5.000000e-01 : f32
    %92 = vector.broadcast %cst_77 : f32 to vector<8x128xf32>
    %93 = arith.addf %92, %91 : vector<8x128xf32>
    %94 = arith.mulf %86, %93 : vector<8x128xf32>
    %95 = arith.truncf %94 : vector<8x128xf32> to vector<8x128xbf16>
    %c0_78 = arith.constant 0 : index
    %c0_79 = arith.constant 0 : index
    %c128 = arith.constant 128 : index
    %96 = vector.load %arg5[%c0_78, %c0_79, %c128] : memref<1x8x256xbf16, #tpu.memory_space<vmem>>, vector<1x8x128xbf16>
    %97 = vector.shape_cast %96 : vector<1x8x128xbf16> to vector<8x128xbf16>
    %98 = vector.shape_cast %95 : vector<8x128xbf16> to vector<1x8x128xbf16>
    tpu.vector_store %arg5[%c0_78, %c0_79, %c128], %98 {strides = array<i32>} : memref<1x8x256xbf16, #tpu.memory_space<vmem>>, vector<1x8x128xbf16>,
    return
  }
  func.func @transform_1(%arg0: i32, %arg1: i32) -> (i32, i32) {
    %c0_i32 = arith.constant 0 : i32
    %c0_i32_0 = arith.constant 0 : i32
    %c0_i32_1 = arith.constant 0 : i32
    return %c0_i32, %c0_i32_0 : i32, i32
  }
  func.func @transform_2(%arg0: i32, %arg1: i32) -> (i32, i32) {
    %c0_i32 = arith.constant 0 : i32
    %c0_i32_0 = arith.constant 0 : i32
    %c0_i32_1 = arith.constant 0 : i32
    return %c0_i32, %c0_i32_0 : i32, i32
  }
  func.func @transform_3(%arg0: i32, %arg1: i32) -> (i32, i32, i32) {
    %c0_i32 = arith.constant 0 : i32
    %c0_i32_0 = arith.constant 0 : i32
    return %arg0, %c0_i32, %arg1 : i32, i32, i32
  }
}

</mosaic_0001>

<bundles_post_ra>
// kernel: tpu_custom_call.1
= control target key start
LH: loop header
LB: loop body
LE: loop exit
PB: predicated region body
PF: predicated region fallthrough
CT: control target
= control target key end

     0   :  { %s1075_s0 = inlined_call_operand.hbm [shape: bf16[2,4,640], index: 0, kind: input, shape index: {}]   ;;  %s1076_s1 = inlined_call_operand.vmem [shape: bf16[8,36], index: 1, kind: input, shape index: {}]   ;;  %s1077_s2 = inlined_call_operand.vmem [shape: f32[8,1], index: 2, kind: input, shape index: {}]   ;;  %s1078_s3 = inlined_call_operand.hbm [shape: bf16[2,8,512], index: 3, kind: output, shape index: {}]  }
   0x1   :  { %1083 = sst [smem:[#allocation18_spill]] %s1076_s1 }
   0x2   :  { %1084 = sst [smem:[#allocation19_spill]] %s1077_s2 }
   0x3   :  { %8 = vsyncpa [#allocation5], 0 }
   0x4   :  { %10 = vsyncpa [#allocation5 + $0x1], 0  ;;  %s850_s12 = smov 0   ;;  %s852_s13 = smov 0  }
   0x5   :  { %s854_s14 = smov 0   ;;  %s856_s15 = smov 0  }
   0x6   :  { %s858_s16 = smov 0   ;;  %s860_s17 = smov 0  }
   0x7   :  { %s862_s18 = smov 0   ;;  %s864_s19 = smov 0  }
   0x8 LB: > { %1085 = sst [smem:[#allocation15_spill]] %s813_s18  ;;  %s565_s20 = sadd.s32 4294967295, %s817_s19   ;;  %s817_s19 = sphi %s864_s19, %s16_s19   ;;  %s813_s18 = sphi %s862_s18, %s1095_s18   ;;  %s809_s17 = sphi %s860_s17, %s1100_s17   ;;  %s805_s16 = sphi %s858_s16, %s1093_s16   ;;  %s801_s15 = sphi %s856_s15, %s1099_s15   ;;  %s797_s14 = sphi %s854_s14, %s1098_s14   ;;  %s793_s13 = sphi %s852_s13, %s1097_s13   ;;  %s789_s12 = sphi %s850_s12, %s1096_s12  }
   0x9   : > { %s566_s21 = sadd.s32 4294967294, %s817_s19   ;;  %s25_s22 = sadd.s32 1, %s809_s17 }
   0xa   : > { %p26_p0 = scmp.ge.s32.totalorder %s25_s22, 2  ;;  %s28_s23 = sadd.s32 1, %s813_s18 }
   0xb   : > { %p89_p1 = scmp.ne.s32.totalorder %s797_s14, %s793_s13  ;;  %p90_p2 = scmp.eq.s32.totalorder %s565_s20, 3 }
   0xc   : > { %s1102_s22 = smov (%p26_p0, %s25_s22), 0  ;;  %s1104_s23 = smov (!%p26_p0, %s28_s23), %s813_s18 }
   0xd   : > { %1086 = sst [smem:[#allocation16_spill]] %s1102_s22  ;;  %s75_s24 = ssub.s32 %s809_s17, %s1102_s22 }
   0xe   : > { %p901_p3 = por %p90_p2, %p89_p1  ;;  %p30_p4 = scmp.ge.s32.totalorder %s1104_s23, 2 }
   0xf   : > { %p95_p5 = scmp.ne.s32.totalorder %s793_s13, %s789_s12  ;;  %p96_p6 = scmp.eq.s32.totalorder %s566_s21, 3 }
  0x10   : > { %p568_p7 = scmp.ge.s32.totalorder %s817_s19, 1  ;;  %s1106_s23 = smov (%p30_p4, %s1104_s23), 0 }
  0x11   : > { %1088 = sst [smem:[#allocation17_spill]] %s1106_s23  ;;  %p910_p8 = por %p96_p6, %p95_p5 }
  0x12   : > { %p120_p9 = scmp.lt.s32.totalorder %s817_s19, 5  ;;  %s74_s27 = ssub.s32 %s813_s18, %s1106_s23 }
  0x13   : > { %s79_s28 = sadd.s32 1, %s797_s14  ;;  %s76_s29 = sor.u32 %s75_s24, %s74_s27 }
  0x14   : > { %p121_p10 = pnand %p568_p7, %p120_p9  ;;  %p77_p11 = scmp.eq.s32.totalorder %s76_s29, 0 }
  0x15   : > { %s1081_s4 = sand.u32 (!%p121_p10), 1, %s793_s13   ;;  %s570_s5 = sshll.u32 (!%p121_p10), %s801_s15, 8 }
  0x16   : > { %s919_s30 = scalar_select %p77_p11, %s797_s14, %s79_s28  }
  0x17   : > { %124 = sbr.rel (%p121_p10) target bundleno = 752 (0x2f0), region = 28  ;;  %s1090_s1 = sld [smem:[#allocation18_spill]] (!%p121_p10) }
  0x18   : > { %s1091_s2 = sld [smem:[#allocation19_spill]] (!%p121_p10)  ;;  %s935_s10 = sshll.u32 (!%p121_p10), %s1081_s4, 3 }
  0x19   : > { %s140_s11 = sshra.s32 (!%p121_p10), %s570_s5, 7  ;;  %s142_s20 = smul.u32 (!%p121_p10), 5, %s805_s16 }
  0x1a   : > { %s159_s21 = sadd.s32 (!%p121_p10), 128, %s570_s5  ;;  %s819_s27 = smov (!%p121_p10), [#allocation2]  }
  0x1b   : > { %s143_s24 = sadd.s32 (!%p121_p10), %s142_s20, %s140_s11  ;;  %s155_s28 = sshll.u32 (!%p121_p10), %s819_s27, 4  ;;  %s156_s28 = int_to_ptr.vmem [resolvable:$true] %s155_s28 }
  0x1c   : > { %s571_s29 = sshll.u32 %s143_s24, 1  ;;  %s675_s11 = scalar_lea.hbm %s1075_s0, 20 }
  0x1d   : > { %v926_v0 = vld [vmem:[%s1090_s1] sm:$0xf]  ;;  %s145_s7 = scalar_lea.hbm %s1075_s0, %s571_s29  ;;  %s160_s1 = sshra.s32 %s159_s21, 7 }
  0x1e   : > { %v931_v1 = vld [vmem:[%s1091_s2] sm:$0xff]  ;;  %s153_s22 = sshll.u32 %s145_s7, 4  ;;  %s162_s8 = sadd.s32 %s160_s1, %s142_s20  ;;  %s154_s22 = int_to_ptr.hbm [resolvable:$true] %s153_s22 }
  0x1f   : > { %s572_s9 = sshll.u32 %s162_s8, 1  ;;  %s671_s2 = sshra.s32 %s154_s22, 4  ;;  %s672_s2 = int_to_ptr.hbm [resolvable:$true] %s671_s2 }
  0x20   : > { %s673_s4 = scalar_lea.hbm %s672_s2, 4  ;;  %p676_p13 = scmp.lt.s32.totalorder %s672_s2, %s1075_s0 }
  0x21   : > { %p674_p12 = scmp.ne.s32.totalorder %s672_s2, %s673_s4  ;;  %p677_p0 = scmp.lt.s32.totalorder %s675_s11, %s673_s4 }
  0x23   : > { %p678_p1 = por %p677_p0, %p676_p13 }
  0x25   : > { %p679_p2 = pnand %p678_p1, %p674_p12 }
  0x27   : > { %682 = shalt.err (!%p679_p2)  }
  0x28   : > { %158 = dma.hbm_to_vmem [thread:$0]  %s154_s22, 64, %s156_s28, [#allocation3] }
  0x29   : > { %s164_s20 = scalar_lea.hbm %s1075_s0, %s572_s9  ;;  %s820_s29 = smov [#allocation2 + $0x4]  }
  0x2a   : > { %s174_s21 = sshll.u32 %s164_s20, 4  ;;  %s176_s6 = sshll.u32 %s820_s29, 4  ;;  %s175_s21 = int_to_ptr.hbm [resolvable:$true] %s174_s21  ;;  %s177_s6 = int_to_ptr.vmem [resolvable:$true] %s176_s6 }
  0x2b   : > { %s695_s18 = sshra.s32 %s175_s21, 4  ;;  %s696_s18 = int_to_ptr.hbm [resolvable:$true] %s695_s18 }
  0x2c   : > { %s697_s7 = scalar_lea.hbm %s696_s18, 4  ;;  %p700_p5 = scmp.lt.s32.totalorder %s696_s18, %s1075_s0 }
  0x2d   : > { %p698_p4 = scmp.ne.s32.totalorder %s696_s18, %s697_s7  ;;  %p701_p6 = scmp.lt.s32.totalorder %s675_s11, %s697_s7 }
  0x2f   : > { %p702_p7 = por %p701_p6, %p700_p5 }
  0x31   : > { %p703_p9 = pnand %p702_p7, %p698_p4 }
  0x33   : > { %706 = shalt.err (!%p703_p9)  }
  0x34   : > { %179 = dma.hbm_to_vmem [thread:$0]  %s175_s21, 64, %s177_s6, [#allocation3 + $0x1] }
  0x35   : > { %s954_s22 = scalar_lea.vmem [#allocation4], %s935_s10 }
  0x36   : > { %779 = dma.done.wait [#allocation3], 64 }
  0x37   : > { %780 = vsyncadd [#allocation3], 4294967232  ;;  %v187_v2 = vld [vmem:[#allocation2] sm:$0xf]  ;;  %s821_s4 = smov 127   ;;  %s822_s28 = smov 126  }
  0x38   : > { %190 = vst [vmem:[#allocation1 + $0x1] ss:$4 sm:$0xff] %v187_v2  ;;  %s823_s10 = smov 109   ;;  %s824_s9 = smov 108   ;;  %v829_v26 = vmov 0   ;;  %vm234_vm0 = vcmask 891904  }
  0x39   : > { %s825_s5 = smov 92   ;;  %s826_s11 = smov 91   ;;  %665 = vset.pattern.permute.xlu1 %v829_v26  ;;  %666 = vset.pattern.permute.xlu0 %v829_v26  ;;  %vm246_vm1 = vcmask 883712   ;;  %vm281_vm2 = vcmask 736256   ;;  %vm258_vm3 = vcmask 752640   ;;  %vm283_vm4 = vcmask 1041408  }
  0x3a   : > { %s827_s27 = smov 90   ;;  %s828_s24 = smov 110   ;;  %vm270_vm5 = vcmask 744448   ;;  %vm199_vm6 = vcmask 1039360   ;;  %vm287_vm7 = vcmask 1043456   ;;  %vm211_vm8 = vcmask 1031168  }
  0x3b   : > { %vm290_vm9 = vcmask 1045504   ;;  %v186_v42 = vld [vmem:[#allocation2] sm:$0x3]  ;;  %vm223_vm10 = vcmask 900096   ;;  %vm307_vm11 = vcmask 293888  }
  0x3f   : > { %v191_v3 = vld.sshfl [vmem:[#allocation1] sm:$0xff pattern:$0x73625140]  ;;  %v193_v4 = vld.sshfl [vmem:[#allocation1 + $0x8] sm:$0xff pattern:$0x73625140] }
  0x40   : > { %195 = vrot.lane.b32.xlu1 %v191_v3, %s821_s4  ;;  %202 = vst [vmem:[#allocation1 + $0x2] ss:$4 sm:$0xff] %v187_v2  ;;  %197 = vrot.lane.b32.xlu2 %v193_v4, %s821_s4 }
  0x47   : > { %v203_v5 = vld.sshfl [vmem:[#allocation1] sm:$0xff pattern:$0x73625140]  ;;  %v205_v6 = vld.sshfl [vmem:[#allocation1 + $0x8] sm:$0xff pattern:$0x73625140] }
  0x48   : > { %214 = vst [vmem:[#allocation1 + $0x3] ss:$4 sm:$0xff] %v187_v2  ;;  %207 = vrot.lane.b32.xlu0 %v203_v5, %s822_s28 }
  0x4f   : > { %v215_v7 = vld.sshfl [vmem:[#allocation1] sm:$0xff pattern:$0x73625140]  ;;  %v217_v8 = vld.sshfl [vmem:[#allocation1 + $0x8] sm:$0xff pattern:$0x73625140] }
  0x50   : > { %225 = vst [vmem:[#allocation1] ss:$4 sm:$0xff] %v187_v2 }
  0x57   : > { %v226_v9 = vld.sshfl [vmem:[#allocation1] sm:$0xff pattern:$0x73625140]  ;;  %v228_v10 = vld.sshfl [vmem:[#allocation1 + $0x8] sm:$0xff pattern:$0x73625140] }
  0x58   : > { %230 = vrot.lane.b32.xlu1 %v226_v9, %s823_s10  ;;  %237 = vst [vmem:[#allocation1 + $0x1] ss:$4 sm:$0xff] %v187_v2 }
  0x5f   : > { %v238_v11 = vld.sshfl [vmem:[#allocation1] sm:$0xff pattern:$0x73625140]  ;;  %v240_v12 = vld.sshfl [vmem:[#allocation1 + $0x8] sm:$0xff pattern:$0x73625140] }
  0x60   : > { %232 = vrot.lane.b32.xlu1 %v228_v10, %s823_s10  ;;  %249 = vst [vmem:[#allocation1 + $0x2] ss:$4 sm:$0xff] %v187_v2  ;;  %242 = vrot.lane.b32.xlu2 %v238_v11, %s824_s9 }
  0x67   : > { %v252_v13 = vld.sshfl [vmem:[#allocation1 + $0x8] sm:$0xff pattern:$0x73625140]  ;;  %v250_v14 = vld.sshfl [vmem:[#allocation1] sm:$0xff pattern:$0x73625140] }
  0x68   : > { %256 = vrot.lane.b32.xlu1 %v252_v13, %s825_s5  ;;  %254 = vrot.lane.b32.xlu0 %v250_v14, %s825_s5  ;;  %261 = vst [vmem:[#allocation1 + $0x3] ss:$4 sm:$0xff] %v187_v2 }
  0x69   : > { %244 = vrot.lane.b32.xlu2 %v240_v12, %s824_s9 }
  0x6f   : > { %v262_v15 = vld.sshfl [vmem:[#allocation1] sm:$0xff pattern:$0x73625140]  ;;  %v264_v16 = vld.sshfl [vmem:[#allocation1 + $0x8] sm:$0xff pattern:$0x73625140] }
  0x70   : > { %209 = vrot.lane.b32.xlu1 %v205_v6, %s822_s28  ;;  %268 = vrot.lane.b32.xlu0 %v264_v16, %s826_s11  ;;  %272 = vst [vmem:[#allocation1] ss:$4 sm:$0xff] %v187_v2 }
  0x71   : > { %266 = vrot.lane.b32.xlu2 %v262_v15, %s826_s11 }
  0x77   : > { %v273_v17 = vld.sshfl [vmem:[#allocation1] sm:$0xff pattern:$0x73625140]  ;;  %v275_v18 = vld.sshfl [vmem:[#allocation1 + $0x8] sm:$0xff pattern:$0x73625140] }
  0x78   : > { %277 = vrot.lane.b32.xlu0 %v273_v17, %s827_s27  ;;  %304 = vperm.xlu1 %665, %v931_v1  }
  0x79   : > { %219 = vrot.lane.b32.xlu2 %v215_v7, %s828_s24 }
  0x80   : > { %279 = vrot.lane.b32.xlu0 %v275_v18, %s827_s27 }
  0x88   : > { %221 = vrot.lane.b32.xlu0 %v217_v8, %s828_s24 }
  0x9a   : > { %v198_v21 = vpop.permute.xlu2 %197 }
  0xb2   : > { %v196_v19 = vpop.permute.xlu1 %195 }
  0xb3   : > { %v200_v41 = vsel %vm199_vm6, %v196_v19, %v198_v21 }
  0xb4   : > { %v286_v47 = vsel %vm283_vm4, %v186_v42, %v200_v41 }
  0xba   : > { %v208_v20 = vpop.permute.xlu0 %207  ;;  %v243_v24 = vpop.permute.xlu2 %242 }
  0xc3   : > { %v245_v28 = vpop.permute.xlu2 %244 }
  0xc4   : > { %v247_v33 = vsel %vm246_vm1, %v243_v24, %v245_v28 }
  0xca   : > { %v231_v22 = vpop.permute.xlu1 %230 }
  0xcb   : > { %v267_v31 = vpop.permute.xlu2 %266 }
  0xd2   : > { %v233_v25 = vpop.permute.xlu1 %232 }
  0xd3   : > { %v235_v32 = vsel %vm234_vm0, %v231_v22, %v233_v25  ;;  %v220_v46 = vpop.permute.xlu2 %219 }
  0xd4   : > { %v296_v37 = vsel %vm283_vm4, %v235_v32, %v247_v33 }
  0xda   : > { %v255_v23 = vpop.permute.xlu0 %254  ;;  %v257_v30 = vpop.permute.xlu1 %256 }
  0xdb   : > { %v259_v36 = vsel %vm258_vm3, %v255_v23, %v257_v30 }
  0xdc   : > { %v298_v43 = vsel %vm287_vm7, %v296_v37, %v259_v36 }
  0xe2   : > { %v269_v27 = vpop.permute.xlu0 %268  ;;  %v210_v39 = vpop.permute.xlu1 %209 }
  0xe3   : > { %v271_v40 = vsel %vm270_vm5, %v267_v31, %v269_v27  ;;  %v212_v44 = vsel %vm211_vm8, %v208_v20, %v210_v39 }
  0xe4   : > { %v300_v45 = vsel %vm290_vm9, %v298_v43, %v271_v40  ;;  %v289_v50 = vsel %vm287_vm7, %v286_v47, %v212_v44 }
  0xea   : > { %v278_v29 = vpop.permute.xlu0 %277  ;;  %v990_v52 = vpop.permute.xlu1 %304 }
  0xf2   : > { %v280_v34 = vpop.permute.xlu0 %279 }
  0xf3   : > { %v282_v35 = vsel %vm281_vm2, %v278_v29, %v280_v34 }
  0xf4   : > { %v312_v38 = vsel %vm283_vm4, %v282_v35, 0 }
  0xf5   : > { %319 = vmatpush.bf16.msra.mxu0 %v312_v38 }
  0xf9   : > { %320 = vmatpush.bf16.msra.mxu0 %v300_v45 }
  0xfa   : > { %v222_v48 = vpop.permute.xlu0 %221 }
  0xfb   : > { %v224_v49 = vsel %vm223_vm10, %v220_v46, %v222_v48 }
  0xfc   : > { %v292_v51 = vsel %vm290_vm9, %v289_v50, %v224_v49 }
  0xfd   : > { %321 = vmatpush.bf16.msra.mxu0 %v292_v51 }
 0x100   : > { %573 = vmatmul.msk.bf16.vlgmr.msra.gmra.mxu0 %vm307_vm11, %v926_v0 }
 0x17d   : > { %v323_v53 = vpop.f32.mrf.mxu0 }
 0x17e   : > { %v324_v54 = vadd.f32 %v323_v53, %v990_v52 }
 0x180   : > { %v327_v55 = vmul.f32 0.5, %v324_v54 }
 0x182   : > { %667 = vtanh.f32 %v327_v55 }
 0x185   : > { %v325_v56 = vpop.f32.mrf.mxu0 }
 0x188   : > { %v668_v57 = vpop.eup %667 }
 0x189   : > { %v329_v58 = vmul.f32 0.5, %v668_v57 }
 0x18b   : > { %v330_v59 = vadd.f32 0.5, %v329_v58 }
 0x18d   : > { %v331_v60 = vmul.f32 %v330_v59, %v324_v54 }
 0x18f   : > { %v332_v61 = vpack.c.bf16 %v331_v60, %v331_v60 }
 0x191   : > { %333 = vst [vmem:[%s954_s22] sm:$0xf] %v332_v61 }
 0x192   : > { %781 = dma.done.wait [#allocation3 + $0x1], 64 }
 0x193   : > { %782 = vsyncadd [#allocation3 + $0x1], 4294967232  ;;  %v337_v62 = vld [vmem:[#allocation2 + $0x4] sm:$0xf]  ;;  %s576_s1 = sshll.u32 %s801_s15, 1  ;;  %s577_s23 = sshll.u32 %s805_s16, 2 }
 0x194   : > { %340 = vst [vmem:[#allocation1 + $0x1] ss:$4 sm:$0xff] %v337_v62  ;;  %v336_v37 = vld [vmem:[#allocation2 + $0x4] sm:$0x3]  ;;  %s476_s20 = sadd.s32 %s577_s23, %s576_s1  ;;  %s480_s7 = sshll.u32 %s954_s22, 4  ;;  %s481_s7 = int_to_ptr.vmem [resolvable:$true] %s480_s7 }
 0x195   : > { %s578_s21 = sshll.u32 %s476_s20, 2  ;;  %s1092_s15 = sand.u32 1, %s793_s13  }
 0x196   : > { %s478_s18 = scalar_lea.hbm %s1078_s3, %s578_s21  ;;  %s465_s16 = scalar_lea.sflag [#allocation5], %s1092_s15 }
 0x197   : > { %s482_s8 = sshll.u32 %s478_s18, 4  ;;  %s483_s8 = int_to_ptr.hbm [resolvable:$true] %s482_s8 }
 0x198   : > { %s733_s2 = sshra.s32 %s483_s8, 4  ;;  %s734_s2 = int_to_ptr.hbm [resolvable:$true] %s733_s2 }
 0x199   : > { %p740_p13 = scmp.lt.s32.totalorder %s734_s2, %s1078_s3 }
 0x19b   : > { %v341_v63 = vld.sshfl [vmem:[#allocation1] sm:$0xff pattern:$0x73625140]  ;;  %v343_v1 = vld.sshfl [vmem:[#allocation1 + $0x8] sm:$0xff pattern:$0x73625140] }
 0x19c   : > { %345 = vrot.lane.b32.xlu1 %v341_v63, %s821_s4  ;;  %351 = vst [vmem:[#allocation1 + $0x2] ss:$4 sm:$0xff] %v337_v62  ;;  %347 = vrot.lane.b32.xlu2 %v343_v1, %s821_s4  ;;  %s735_s4 = scalar_lea.hbm %s734_s2, 8 }
 0x19d   : > { %p736_p10 = scmp.ne.s32.totalorder %s734_s2, %s735_s4 }
 0x19f   : > { %p737_p11 = pnand %p736_p10, %p901_p3 }
 0x1a1   : > { %p738_p12 = pneg %p737_p11 }
 0x1a3   : > { %v352_v2 = vld.sshfl [vmem:[#allocation1] sm:$0xff pattern:$0x73625140]  ;;  %v354_v3 = vld.sshfl [vmem:[#allocation1 + $0x8] sm:$0xff pattern:$0x73625140] }
 0x1a4   : > { %362 = vst [vmem:[#allocation1 + $0x3] ss:$4 sm:$0xff] %v337_v62  ;;  %356 = vrot.lane.b32.xlu0 %v352_v2, %s822_s28 }
 0x1ab   : > { %v363_v4 = vld.sshfl [vmem:[#allocation1] sm:$0xff pattern:$0x73625140]  ;;  %v365_v5 = vld.sshfl [vmem:[#allocation1 + $0x8] sm:$0xff pattern:$0x73625140] }
 0x1ac   : > { %372 = vst [vmem:[#allocation1] ss:$4 sm:$0xff] %v337_v62 }
 0x1b3   : > { %v373_v6 = vld.sshfl [vmem:[#allocation1] sm:$0xff pattern:$0x73625140]  ;;  %v375_v7 = vld.sshfl [vmem:[#allocation1 + $0x8] sm:$0xff pattern:$0x73625140] }
 0x1b4   : > { %377 = vrot.lane.b32.xlu1 %v373_v6, %s823_s10  ;;  %383 = vst [vmem:[#allocation1 + $0x1] ss:$4 sm:$0xff] %v337_v62 }
 0x1bb   : > { %v384_v8 = vld.sshfl [vmem:[#allocation1] sm:$0xff pattern:$0x73625140]  ;;  %v386_v9 = vld.sshfl [vmem:[#allocation1 + $0x8] sm:$0xff pattern:$0x73625140] }
 0x1bc   : > { %379 = vrot.lane.b32.xlu1 %v375_v7, %s823_s10  ;;  %394 = vst [vmem:[#allocation1 + $0x2] ss:$4 sm:$0xff] %v337_v62  ;;  %388 = vrot.lane.b32.xlu2 %v384_v8, %s824_s9 }
 0x1c3   : > { %v397_v10 = vld.sshfl [vmem:[#allocation1 + $0x8] sm:$0xff pattern:$0x73625140]  ;;  %v395_v11 = vld.sshfl [vmem:[#allocation1] sm:$0xff pattern:$0x73625140] }
 0x1c4   : > { %401 = vrot.lane.b32.xlu1 %v397_v10, %s825_s5  ;;  %399 = vrot.lane.b32.xlu0 %v395_v11, %s825_s5  ;;  %405 = vst [vmem:[#allocation1 + $0x3] ss:$4 sm:$0xff] %v337_v62 }
 0x1c5   : > { %390 = vrot.lane.b32.xlu2 %v386_v9, %s824_s9  ;;  %s739_s9 = scalar_lea.hbm %s1078_s3, 32 }
 0x1c6   : > { %p741_p0 = scmp.lt.s32.totalorder %s739_s9, %s735_s4 }
 0x1c8   : > { %p742_p1 = por %p741_p0, %p740_p13 }
 0x1ca   : > { %p743_p2 = pnand %p742_p1, %p738_p12 }
 0x1cb   : > { %v406_v12 = vld.sshfl [vmem:[#allocation1] sm:$0xff pattern:$0x73625140]  ;;  %v408_v13 = vld.sshfl [vmem:[#allocation1 + $0x8] sm:$0xff pattern:$0x73625140] }
 0x1cc   : > { %358 = vrot.lane.b32.xlu1 %v354_v3, %s822_s28  ;;  %412 = vrot.lane.b32.xlu0 %v408_v13, %s826_s11  ;;  %415 = vst [vmem:[#allocation1] ss:$4 sm:$0xff] %v337_v62 }
 0x1cd   : > { %410 = vrot.lane.b32.xlu2 %v406_v12, %s826_s11 }
 0x1d3   : > { %v416_v14 = vld.sshfl [vmem:[#allocation1] sm:$0xff pattern:$0x73625140]  ;;  %v418_v15 = vld.sshfl [vmem:[#allocation1 + $0x8] sm:$0xff pattern:$0x73625140] }
 0x1d4   : > { %420 = vrot.lane.b32.xlu0 %v416_v14, %s827_s27 }
 0x1d5   : > { %367 = vrot.lane.b32.xlu2 %v363_v4, %s828_s24 }
 0x1dc   : > { %422 = vrot.lane.b32.xlu0 %v418_v15, %s827_s27 }
 0x1e4   : > { %369 = vrot.lane.b32.xlu0 %v365_v5, %s828_s24 }
 0x1f6   : > { %v348_v18 = vpop.permute.xlu2 %347 }
 0x20e   : > { %v346_v16 = vpop.permute.xlu1 %345 }
 0x20f   : > { %v349_v38 = vsel %vm199_vm6, %v346_v16, %v348_v18 }
 0x210   : > { %v427_v43 = vsel %vm283_vm4, %v336_v37, %v349_v38 }
 0x216   : > { %v357_v17 = vpop.permute.xlu0 %356  ;;  %v389_v21 = vpop.permute.xlu2 %388 }
 0x21f   : > { %v391_v24 = vpop.permute.xlu2 %390 }
 0x220   : > { %v392_v29 = vsel %vm246_vm1, %v389_v21, %v391_v24 }
 0x226   : > { %v378_v19 = vpop.permute.xlu1 %377 }
 0x227   : > { %v411_v27 = vpop.permute.xlu2 %410 }
 0x22e   : > { %v380_v22 = vpop.permute.xlu1 %379 }
 0x22f   : > { %v381_v28 = vsel %vm234_vm0, %v378_v19, %v380_v22  ;;  %v368_v42 = vpop.permute.xlu2 %367 }
 0x230   : > { %v435_v32 = vsel %vm283_vm4, %v381_v28, %v392_v29 }
 0x236   : > { %v400_v20 = vpop.permute.xlu0 %399  ;;  %v402_v26 = vpop.permute.xlu1 %401 }
 0x237   : > { %v403_v33 = vsel %vm258_vm3, %v400_v20, %v402_v26 }
 0x238   : > { %v437_v39 = vsel %vm287_vm7, %v435_v32, %v403_v33 }
 0x23e   : > { %v413_v23 = vpop.permute.xlu0 %412  ;;  %v359_v35 = vpop.permute.xlu1 %358 }
 0x23f   : > { %v414_v36 = vsel %vm270_vm5, %v411_v27, %v413_v23  ;;  %v360_v40 = vsel %vm211_vm8, %v357_v17, %v359_v35 }
 0x240   : > { %v439_v41 = vsel %vm290_vm9, %v437_v39, %v414_v36  ;;  %v429_v46 = vsel %vm287_vm7, %v427_v43, %v360_v40 }
 0x246   : > { %v421_v25 = vpop.permute.xlu0 %420 }
 0x24e   : > { %v423_v30 = vpop.permute.xlu0 %422 }
 0x24f   : > { %v424_v31 = vsel %vm281_vm2, %v421_v25, %v423_v30 }
 0x250   : > { %v442_v34 = vsel %vm283_vm4, %v424_v31, 0 }
 0x251   : > { %449 = vmatpush.bf16.msra.mxu1 %v442_v34 }
 0x255   : > { %450 = vmatpush.bf16.msra.mxu1 %v439_v41 }
 0x256   : > { %v370_v44 = vpop.permute.xlu0 %369 }
 0x257   : > { %v371_v45 = vsel %vm223_vm10, %v368_v42, %v370_v44 }
 0x258   : > { %v431_v47 = vsel %vm290_vm9, %v429_v46, %v371_v45 }
 0x259   : > { %451 = vmatpush.bf16.msra.mxu1 %v431_v47 }
 0x25c   : > { %574 = vmatmul.msk.bf16.vlgmr.msra.gmra.mxu1 %vm307_vm11, %v926_v0 }
 0x2d9   : > { %v453_v48 = vpop.f32.mrf.mxu1 }
 0x2da   : > { %v454_v49 = vadd.f32 %v453_v48, %v990_v52 }
 0x2dc   : > { %v457_v50 = vmul.f32 0.5, %v454_v49 }
 0x2de   : > { %669 = vtanh.f32 %v457_v50 }
 0x2e1   : > { %v455_v51 = vpop.f32.mrf.mxu1 }
 0x2e4   : > { %v670_v53 = vpop.eup %669 }
 0x2e5   : > { %v459_v54 = vmul.f32 0.5, %v670_v53 }
 0x2e7   : > { %v460_v0 = vadd.f32 0.5, %v459_v54 }
 0x2e9   : > { %v461_v52 = vmul.f32 %v460_v0, %v454_v49 }
 0x2eb   : > { %v462_v55 = vpack.c.bf16 %v461_v52, %v461_v52 }
 0x2ed   : > { %463 = vst [vmem:[%s954_s22 + $0x4] sm:$0xf] %v462_v55 }
 0x2ee   : > { %746 = shalt.err (!%p743_p2)
}
 0x2ef   : > { %583 = dma.vmem_to_hbm [thread:$0]  (%p901_p3), %s481_s7, 128, %s483_s8, %s465_s16  }
 0x2f0 PF: > { %p589_p4 = scmp.ge.s32.totalorder %s817_s19, 2  ;;  %s494_s22 = sand.u32 1, %s789_s12  }
 0x2f1   : > { %s495_s27 = scalar_lea.sflag [#allocation5], %s494_s22 }
 0x2f2   : > { %p586_p5 = pnand %p589_p4, %p910_p8 }
 0x2f4   : > { %p587_p6 = pneg %p586_p5 }
 0x2f6   : > { %784 = dma.done.wait (%p587_p6), %s495_s27, 128  }
 0x2f7   : > { %786 = vsyncadd (%p587_p6), %s495_s27, 4294967168  ;;  %s16_s19 = sadd.s32 1, %s817_s19   ;;  %s1093_s16 = sld [smem:[#allocation15_spill]] }
 0x2f8   : > { %p13_p7 = scmp.ge.s32.totalorder %s16_s19, 6   ;;  %s1094_s25 = sld [smem:[#allocation16_spill]] }
 0x2f9   : > { %s1095_s18 = sld [smem:[#allocation17_spill]]  ;;  %s1096_s12 = smov %s793_s13 }
 0x2fa   : > { %s1097_s13 = smov %s797_s14  ;;  %s1098_s14 = smov %s919_s30 }
 0x2fb   : > { %s1099_s15 = smov %s809_s17  ;;  %15 = sbr.rel (!%p13_p7) target bundleno = 8 (0x8), region = 85 }
 0x2fe   : > { %s1100_s17 = smov %s1094_s25 }
 0x300   :  { %501 = vsyncpa [#allocation5], 1 }
 0x301   :  { %503 = vsyncpa [#allocation5 + $0x1], 1 }
 0x302   :  { %504 = vsyncmov [#allocation3] }
 0x305   :  { %s505_s26 = vpop.sfrf %504 }
 0x306   :  { %p581_p3 = scmp.ne.s32.totalorder %s505_s26, 0 }
 0x308   :  { %509 = shalt.err (%p581_p3)  }
 0x309   :  { %511 = vsyncmov [#allocation3 + $0x1] }
 0x30c   :  { %s512_s24 = vpop.sfrf %511 }
 0x30d   :  { %p582_p8 = scmp.ne.s32.totalorder %s512_s24, 0 }
 0x30f   :  { %516 = shalt.err (%p582_p8)  }

// kernel: tpu_custom_call.1
= control target key start
LH: loop header
LB: loop body
LE: loop exit
PB: predicated region body
PF: predicated region fallthrough
CT: control target
= control target key end

     0   :  { %s1075_s0 = inlined_call_operand.hbm [shape: bf16[2,4,640], index: 0, kind: input, shape index: {}]   ;;  %s1076_s1 = inlined_call_operand.vmem [shape: bf16[8,36], index: 1, kind: input, shape index: {}]   ;;  %s1077_s2 = inlined_call_operand.vmem [shape: f32[8,1], index: 2, kind: input, shape index: {}]   ;;  %s1078_s3 = inlined_call_operand.hbm [shape: bf16[2,8,512], index: 3, kind: output, shape index: {}]  }
   0x1   :  { %1083 = sst [smem:[#allocation18_spill]] %s1076_s1 }
   0x2   :  { %1084 = sst [smem:[#allocation19_spill]] %s1077_s2 }
   0x3   :  { %8 = vsyncpa [#allocation5], 0 }
   0x4   :  { %10 = vsyncpa [#allocation5 + $0x1], 0  ;;  %s850_s12 = smov 0   ;;  %s852_s13 = smov 0  }
   0x5   :  { %s854_s14 = smov 0   ;;  %s856_s15 = smov 0  }
   0x6   :  { %s858_s16 = smov 0   ;;  %s860_s17 = smov 0  }
   0x7   :  { %s862_s18 = smov 0   ;;  %s864_s19 = smov 0  }
   0x8 LB: > { %1085 = sst [smem:[#allocation15_spill]] %s813_s18  ;;  %s565_s20 = sadd.s32 4294967295, %s817_s19   ;;  %s817_s19 = sphi %s864_s19, %s16_s19   ;;  %s813_s18 = sphi %s862_s18, %s1095_s18   ;;  %s809_s17 = sphi %s860_s17, %s1100_s17   ;;  %s805_s16 = sphi %s858_s16, %s1093_s16   ;;  %s801_s15 = sphi %s856_s15, %s1099_s15   ;;  %s797_s14 = sphi %s854_s14, %s1098_s14   ;;  %s793_s13 = sphi %s852_s13, %s1097_s13   ;;  %s789_s12 = sphi %s850_s12, %s1096_s12  }
   0x9   : > { %s566_s21 = sadd.s32 4294967294, %s817_s19   ;;  %s25_s22 = sadd.s32 1, %s809_s17 }
   0xa   : > { %p26_p0 = scmp.ge.s32.totalorder %s25_s22, 2  ;;  %s28_s23 = sadd.s32 1, %s813_s18 }
   0xb   : > { %p89_p1 = scmp.ne.s32.totalorder %s797_s14, %s793_s13  ;;  %p90_p2 = scmp.eq.s32.totalorder %s565_s20, 3 }
   0xc   : > { %s1102_s22 = smov (%p26_p0, %s25_s22), 0  ;;  %s1104_s23 = smov (!%p26_p0, %s28_s23), %s813_s18 }
   0xd   : > { %1086 = sst [smem:[#allocation16_spill]] %s1102_s22  ;;  %s75_s24 = ssub.s32 %s809_s17, %s1102_s22 }
   0xe   : > { %p901_p3 = por %p90_p2, %p89_p1  ;;  %p30_p4 = scmp.ge.s32.totalorder %s1104_s23, 2 }
   0xf   : > { %p95_p5 = scmp.ne.s32.totalorder %s793_s13, %s789_s12  ;;  %p96_p6 = scmp.eq.s32.totalorder %s566_s21, 3 }
  0x10   : > { %p568_p7 = scmp.ge.s32.totalorder %s817_s19, 1  ;;  %s1106_s23 = smov (%p30_p4, %s1104_s23), 0 }
  0x11   : > { %1088 = sst [smem:[#allocation17_spill]] %s1106_s23  ;;  %p910_p8 = por %p96_p6, %p95_p5 }
  0x12   : > { %p120_p9 = scmp.lt.s32.totalorder %s817_s19, 5  ;;  %s74_s27 = ssub.s32 %s813_s18, %s1106_s23 }
  0x13   : > { %s79_s28 = sadd.s32 1, %s797_s14  ;;  %s76_s29 = sor.u32 %s75_s24, %s74_s27 }
  0x14   : > { %p121_p10 = pnand %p568_p7, %p120_p9  ;;  %p77_p11 = scmp.eq.s32.totalorder %s76_s29, 0 }
  0x15   : > { %s1081_s4 = sand.u32 (!%p121_p10), 1, %s793_s13   ;;  %s570_s5 = sshll.u32 (!%p121_p10), %s801_s15, 8 }
  0x16   : > { %s919_s30 = scalar_select %p77_p11, %s797_s14, %s79_s28  }
  0x17   : > { %124 = sbr.rel (%p121_p10) target bundleno = 752 (0x2f0), region = 28  ;;  %s1090_s1 = sld [smem:[#allocation18_spill]] (!%p121_p10) }
  0x18   : > { %s1091_s2 = sld [smem:[#allocation19_spill]] (!%p121_p10)  ;;  %s935_s10 = sshll.u32 (!%p121_p10), %s1081_s4, 3 }
  0x19   : > { %s140_s11 = sshra.s32 (!%p121_p10), %s570_s5, 7  ;;  %s142_s20 = smul.u32 (!%p121_p10), 5, %s805_s16 }
  0x1a   : > { %s159_s21 = sadd.s32 (!%p121_p10), 128, %s570_s5  ;;  %s819_s27 = smov (!%p121_p10), [#allocation2]  }
  0x1b   : > { %s143_s24 = sadd.s32 (!%p121_p10), %s142_s20, %s140_s11  ;;  %s155_s28 = sshll.u32 (!%p121_p10), %s819_s27, 4  ;;  %s156_s28 = int_to_ptr.vmem [resolvable:$true] %s155_s28 }
  0x1c   : > { %s571_s29 = sshll.u32 %s143_s24, 1  ;;  %s675_s11 = scalar_lea.hbm %s1075_s0, 20 }
  0x1d   : > { %v926_v0 = vld [vmem:[%s1090_s1] sm:$0xf]  ;;  %s145_s7 = scalar_lea.hbm %s1075_s0, %s571_s29  ;;  %s160_s1 = sshra.s32 %s159_s21, 7 }
  0x1e   : > { %v931_v1 = vld [vmem:[%s1091_s2] sm:$0xff]  ;;  %s153_s22 = sshll.u32 %s145_s7, 4  ;;  %s162_s8 = sadd.s32 %s160_s1, %s142_s20  ;;  %s154_s22 = int_to_ptr.hbm [resolvable:$true] %s153_s22 }
  0x1f   : > { %s572_s9 = sshll.u32 %s162_s8, 1  ;;  %s671_s2 = sshra.s32 %s154_s22, 4  ;;  %s672_s2 = int_to_ptr.hbm [resolvable:$true] %s671_s2 }
  0x20   : > { %s673_s4 = scalar_lea.hbm %s672_s2, 4  ;;  %p676_p13 = scmp.lt.s32.totalorder %s672_s2, %s1075_s0 }
  0x21   : > { %p674_p12 = scmp.ne.s32.totalorder %s672_s2, %s673_s4  ;;  %p677_p0 = scmp.lt.s32.totalorder %s675_s11, %s673_s4 }
  0x23   : > { %p678_p1 = por %p677_p0, %p676_p13 }
  0x25   : > { %p679_p2 = pnand %p678_p1, %p674_p12 }
  0x27   : > { %682 = shalt.err (!%p679_p2)  }
  0x28   : > { %158 = dma.hbm_to_vmem [thread:$0]  %s154_s22, 64, %s156_s28, [#allocation3] }
  0x29   : > { %s164_s20 = scalar_lea.hbm %s1075_s0, %s572_s9  ;;  %s820_s29 = smov [#allocation2 + $0x4]  }
  0x2a   : > { %s174_s21 = sshll.u32 %s164_s20, 4  ;;  %s176_s6 = sshll.u32 %s820_s29, 4  ;;  %s175_s21 = int_to_ptr.hbm [resolvable:$true] %s174_s21  ;;  %s177_s6 = int_to_ptr.vmem [resolvable:$true] %s176_s6 }
  0x2b   : > { %s695_s18 = sshra.s32 %s175_s21, 4  ;;  %s696_s18 = int_to_ptr.hbm [resolvable:$true] %s695_s18 }
  0x2c   : > { %s697_s7 = scalar_lea.hbm %s696_s18, 4  ;;  %p700_p5 = scmp.lt.s32.totalorder %s696_s18, %s1075_s0 }
  0x2d   : > { %p698_p4 = scmp.ne.s32.totalorder %s696_s18, %s697_s7  ;;  %p701_p6 = scmp.lt.s32.totalorder %s675_s11, %s697_s7 }
  0x2f   : > { %p702_p7 = por %p701_p6, %p700_p5 }
  0x31   : > { %p703_p9 = pnand %p702_p7, %p698_p4 }
  0x33   : > { %706 = shalt.err (!%p703_p9)  }
  0x34   : > { %179 = dma.hbm_to_vmem [thread:$0]  %s175_s21, 64, %s177_s6, [#allocation3 + $0x1] }
  0x35   : > { %s954_s22 = scalar_lea.vmem [#allocation4], %s935_s10 }
  0x36   : > { %779 = dma.done.wait [#allocation3], 64 }
  0x37   : > { %780 = vsyncadd [#allocation3], 4294967232  ;;  %v187_v2 = vld [vmem:[#allocation2] sm:$0xf]  ;;  %s821_s4 = smov 127   ;;  %s822_s28 = smov 126  }
  0x38   : > { %190 = vst [vmem:[#allocation1 + $0x1] ss:$4 sm:$0xff] %v187_v2  ;;  %s823_s10 = smov 109   ;;  %s824_s9 = smov 108   ;;  %v829_v26 = vmov 0   ;;  %vm234_vm0 = vcmask 891904  }
  0x39   : > { %s825_s5 = smov 92   ;;  %s826_s11 = smov 91   ;;  %665 = vset.pattern.permute.xlu1 %v829_v26  ;;  %666 = vset.pattern.permute.xlu0 %v829_v26  ;;  %vm246_vm1 = vcmask 883712   ;;  %vm281_vm2 = vcmask 736256   ;;  %vm258_vm3 = vcmask 752640   ;;  %vm283_vm4 = vcmask 1041408  }
  0x3a   : > { %s827_s27 = smov 90   ;;  %s828_s24 = smov 110   ;;  %vm270_vm5 = vcmask 744448   ;;  %vm199_vm6 = vcmask 1039360   ;;  %vm287_vm7 = vcmask 1043456   ;;  %vm211_vm8 = vcmask 1031168  }
  0x3b   : > { %vm290_vm9 = vcmask 1045504   ;;  %v186_v42 = vld [vmem:[#allocation2] sm:$0x3]  ;;  %vm223_vm10 = vcmask 900096   ;;  %vm307_vm11 = vcmask 293888  }
  0x3f   : > { %v191_v3 = vld.sshfl [vmem:[#allocation1] sm:$0xff pattern:$0x73625140]  ;;  %v193_v4 = vld.sshfl [vmem:[#allocation1 + $0x8] sm:$0xff pattern:$0x73625140] }
  0x40   : > { %195 = vrot.lane.b32.xlu1 %v191_v3, %s821_s4  ;;  %202 = vst [vmem:[#allocation1 + $0x2] ss:$4 sm:$0xff] %v187_v2  ;;  %197 = vrot.lane.b32.xlu2 %v193_v4, %s821_s4 }
  0x47   : > { %v203_v5 = vld.sshfl [vmem:[#allocation1] sm:$0xff pattern:$0x73625140]  ;;  %v205_v6 = vld.sshfl [vmem:[#allocation1 + $0x8] sm:$0xff pattern:$0x73625140] }
  0x48   : > { %214 = vst [vmem:[#allocation1 + $0x3] ss:$4 sm:$0xff] %v187_v2  ;;  %207 = vrot.lane.b32.xlu0 %v203_v5, %s822_s28 }
  0x4f   : > { %v215_v7 = vld.sshfl [vmem:[#allocation1] sm:$0xff pattern:$0x73625140]  ;;  %v217_v8 = vld.sshfl [vmem:[#allocation1 + $0x8] sm:$0xff pattern:$0x73625140] }
  0x50   : > { %225 = vst [vmem:[#allocation1] ss:$4 sm:$0xff] %v187_v2 }
  0x57   : > { %v226_v9 = vld.sshfl [vmem:[#allocation1] sm:$0xff pattern:$0x73625140]  ;;  %v228_v10 = vld.sshfl [vmem:[#allocation1 + $0x8] sm:$0xff pattern:$0x73625140] }
  0x58   : > { %230 = vrot.lane.b32.xlu1 %v226_v9, %s823_s10  ;;  %237 = vst [vmem:[#allocation1 + $0x1] ss:$4 sm:$0xff] %v187_v2 }
  0x5f   : > { %v238_v11 = vld.sshfl [vmem:[#allocation1] sm:$0xff pattern:$0x73625140]  ;;  %v240_v12 = vld.sshfl [vmem:[#allocation1 + $0x8] sm:$0xff pattern:$0x73625140] }
  0x60   : > { %232 = vrot.lane.b32.xlu1 %v228_v10, %s823_s10  ;;  %249 = vst [vmem:[#allocation1 + $0x2] ss:$4 sm:$0xff] %v187_v2  ;;  %242 = vrot.lane.b32.xlu2 %v238_v11, %s824_s9 }
  0x67   : > { %v252_v13 = vld.sshfl [vmem:[#allocation1 + $0x8] sm:$0xff pattern:$0x73625140]  ;;  %v250_v14 = vld.sshfl [vmem:[#allocation1] sm:$0xff pattern:$0x73625140] }
  0x68   : > { %256 = vrot.lane.b32.xlu1 %v252_v13, %s825_s5  ;;  %254 = vrot.lane.b32.xlu0 %v250_v14, %s825_s5  ;;  %261 = vst [vmem:[#allocation1 + $0x3] ss:$4 sm:$0xff] %v187_v2 }
  0x69   : > { %244 = vrot.lane.b32.xlu2 %v240_v12, %s824_s9 }
  0x6f   : > { %v262_v15 = vld.sshfl [vmem:[#allocation1] sm:$0xff pattern:$0x73625140]  ;;  %v264_v16 = vld.sshfl [vmem:[#allocation1 + $0x8] sm:$0xff pattern:$0x73625140] }
  0x70   : > { %209 = vrot.lane.b32.xlu1 %v205_v6, %s822_s28  ;;  %268 = vrot.lane.b32.xlu0 %v264_v16, %s826_s11  ;;  %272 = vst [vmem:[#allocation1] ss:$4 sm:$0xff] %v187_v2 }
  0x71   : > { %266 = vrot.lane.b32.xlu2 %v262_v15, %s826_s11 }
  0x77   : > { %v273_v17 = vld.sshfl [vmem:[#allocation1] sm:$0xff pattern:$0x73625140]  ;;  %v275_v18 = vld.sshfl [vmem:[#allocation1 + $0x8] sm:$0xff pattern:$0x73625140] }
  0x78   : > { %277 = vrot.lane.b32.xlu0 %v273_v17, %s827_s27  ;;  %304 = vperm.xlu1 %665, %v931_v1  }
  0x79   : > { %219 = vrot.lane.b32.xlu2 %v215_v7, %s828_s24 }
  0x80   : > { %279 = vrot.lane.b32.xlu0 %v275_v18, %s827_s27 }
  0x88   : > { %221 = vrot.lane.b32.xlu0 %v217_v8, %s828_s24 }
  0x9a   : > { %v198_v21 = vpop.permute.xlu2 %197 }
  0xb2   : > { %v196_v19 = vpop.permute.xlu1 %195 }
  0xb3   : > { %v200_v41 = vsel %vm199_vm6, %v196_v19, %v198_v21 }
  0xb4   : > { %v286_v47 = vsel %vm283_vm4, %v186_v42, %v200_v41 }
  0xba   : > { %v208_v20 = vpop.permute.xlu0 %207  ;;  %v243_v24 = vpop.permute.xlu2 %242 }
  0xc3   : > { %v245_v28 = vpop.permute.xlu2 %244 }
  0xc4   : > { %v247_v33 = vsel %vm246_vm1, %v243_v24, %v245_v28 }
  0xca   : > { %v231_v22 = vpop.permute.xlu1 %230 }
  0xcb   : > { %v267_v31 = vpop.permute.xlu2 %266 }
  0xd2   : > { %v233_v25 = vpop.permute.xlu1 %232 }
  0xd3   : > { %v235_v32 = vsel %vm234_vm0, %v231_v22, %v233_v25  ;;  %v220_v46 = vpop.permute.xlu2 %219 }
  0xd4   : > { %v296_v37 = vsel %vm283_vm4, %v235_v32, %v247_v33 }
  0xda   : > { %v255_v23 = vpop.permute.xlu0 %254  ;;  %v257_v30 = vpop.permute.xlu1 %256 }
  0xdb   : > { %v259_v36 = vsel %vm258_vm3, %v255_v23, %v257_v30 }
  0xdc   : > { %v298_v43 = vsel %vm287_vm7, %v296_v37, %v259_v36 }
  0xe2   : > { %v269_v27 = vpop.permute.xlu0 %268  ;;  %v210_v39 = vpop.permute.xlu1 %209 }
  0xe3   : > { %v271_v40 = vsel %vm270_vm5, %v267_v31, %v269_v27  ;;  %v212_v44 = vsel %vm211_vm8, %v208_v20, %v210_v39 }
  0xe4   : > { %v300_v45 = vsel %vm290_vm9, %v298_v43, %v271_v40  ;;  %v289_v50 = vsel %vm287_vm7, %v286_v47, %v212_v44 }
  0xea   : > { %v278_v29 = vpop.permute.xlu0 %277  ;;  %v990_v52 = vpop.permute.xlu1 %304 }
  0xf2   : > { %v280_v34 = vpop.permute.xlu0 %279 }
  0xf3   : > { %v282_v35 = vsel %vm281_vm2, %v278_v29, %v280_v34 }
  0xf4   : > { %v312_v38 = vsel %vm283_vm4, %v282_v35, 0 }
  0xf5   : > { %319 = vmatpush.bf16.msra.mxu0 %v312_v38 }
  0xf9   : > { %320 = vmatpush.bf16.msra.mxu0 %v300_v45 }
  0xfa   : > { %v222_v48 = vpop.permute.xlu0 %221 }
  0xfb   : > { %v224_v49 = vsel %vm223_vm10, %v220_v46, %v222_v48 }
  0xfc   : > { %v292_v51 = vsel %vm290_vm9, %v289_v50, %v224_v49 }
  0xfd   : > { %321 = vmatpush.bf16.msra.mxu0 %v292_v51 }
 0x100   : > { %573 = vmatmul.msk.bf16.vlgmr.msra.gmra.mxu0 %vm307_vm11, %v926_v0 }
 0x17d   : > { %v323_v53 = vpop.f32.mrf.mxu0 }
 0x17e   : > { %v324_v54 = vadd.f32 %v323_v53, %v990_v52 }
 0x180   : > { %v327_v55 = vmul.f32 0.5, %v324_v54 }
 0x182   : > { %667 = vtanh.f32 %v327_v55 }
 0x185   : > { %v325_v56 = vpop.f32.mrf.mxu0 }
 0x188   : > { %v668_v57 = vpop.eup %667 }
 0x189   : > { %v329_v58 = vmul.f32 0.5, %v668_v57 }
 0x18b   : > { %v330_v59 = vadd.f32 0.5, %v329_v58 }
 0x18d   : > { %v331_v60 = vmul.f32 %v330_v59, %v324_v54 }
 0x18f   : > { %v332_v61 = vpack.c.bf16 %v331_v60, %v331_v60 }
 0x191   : > { %333 = vst [vmem:[%s954_s22] sm:$0xf] %v332_v61 }
 0x192   : > { %781 = dma.done.wait [#allocation3 + $0x1], 64 }
 0x193   : > { %782 = vsyncadd [#allocation3 + $0x1], 4294967232  ;;  %v337_v62 = vld [vmem:[#allocation2 + $0x4] sm:$0xf]  ;;  %s576_s1 = sshll.u32 %s801_s15, 1  ;;  %s577_s23 = sshll.u32 %s805_s16, 2 }
 0x194   : > { %340 = vst [vmem:[#allocation1 + $0x1] ss:$4 sm:$0xff] %v337_v62  ;;  %v336_v37 = vld [vmem:[#allocation2 + $0x4] sm:$0x3]  ;;  %s476_s20 = sadd.s32 %s577_s23, %s576_s1  ;;  %s480_s7 = sshll.u32 %s954_s22, 4  ;;  %s481_s7 = int_to_ptr.vmem [resolvable:$true] %s480_s7 }
 0x195   : > { %s578_s21 = sshll.u32 %s476_s20, 2  ;;  %s1092_s15 = sand.u32 1, %s793_s13  }
 0x196   : > { %s478_s18 = scalar_lea.hbm %s1078_s3, %s578_s21  ;;  %s465_s16 = scalar_lea.sflag [#allocation5], %s1092_s15 }
 0x197   : > { %s482_s8 = sshll.u32 %s478_s18, 4  ;;  %s483_s8 = int_to_ptr.hbm [resolvable:$true] %s482_s8 }
 0x198   : > { %s733_s2 = sshra.s32 %s483_s8, 4  ;;  %s734_s2 = int_to_ptr.hbm [resolvable:$true] %s733_s2 }
 0x199   : > { %p740_p13 = scmp.lt.s32.totalorder %s734_s2, %s1078_s3 }
 0x19b   : > { %v341_v63 = vld.sshfl [vmem:[#allocation1] sm:$0xff pattern:$0x73625140]  ;;  %v343_v1 = vld.sshfl [vmem:[#allocation1 + $0x8] sm:$0xff pattern:$0x73625140] }
 0x19c   : > { %345 = vrot.lane.b32.xlu1 %v341_v63, %s821_s4  ;;  %351 = vst [vmem:[#allocation1 + $0x2] ss:$4 sm:$0xff] %v337_v62  ;;  %347 = vrot.lane.b32.xlu2 %v343_v1, %s821_s4  ;;  %s735_s4 = scalar_lea.hbm %s734_s2, 8 }
 0x19d   : > { %p736_p10 = scmp.ne.s32.totalorder %s734_s2, %s735_s4 }
 0x19f   : > { %p737_p11 = pnand %p736_p10, %p901_p3 }
 0x1a1   : > { %p738_p12 = pneg %p737_p11 }
 0x1a3   : > { %v352_v2 = vld.sshfl [vmem:[#allocation1] sm:$0xff pattern:$0x73625140]  ;;  %v354_v3 = vld.sshfl [vmem:[#allocation1 + $0x8] sm:$0xff pattern:$0x73625140] }
 0x1a4   : > { %362 = vst [vmem:[#allocation1 + $0x3] ss:$4 sm:$0xff] %v337_v62  ;;  %356 = vrot.lane.b32.xlu0 %v352_v2, %s822_s28 }
 0x1ab   : > { %v363_v4 = vld.sshfl [vmem:[#allocation1] sm:$0xff pattern:$0x73625140]  ;;  %v365_v5 = vld.sshfl [vmem:[#allocation1 + $0x8] sm:$0xff pattern:$0x73625140] }
 0x1ac   : > { %372 = vst [vmem:[#allocation1] ss:$4 sm:$0xff] %v337_v62 }
 0x1b3   : > { %v373_v6 = vld.sshfl [vmem:[#allocation1] sm:$0xff pattern:$0x73625140]  ;;  %v375_v7 = vld.sshfl [vmem:[#allocation1 + $0x8] sm:$0xff pattern:$0x73625140] }
 0x1b4   : > { %377 = vrot.lane.b32.xlu1 %v373_v6, %s823_s10  ;;  %383 = vst [vmem:[#allocation1 + $0x1] ss:$4 sm:$0xff] %v337_v62 }
 0x1bb   : > { %v384_v8 = vld.sshfl [vmem:[#allocation1] sm:$0xff pattern:$0x73625140]  ;;  %v386_v9 = vld.sshfl [vmem:[#allocation1 + $0x8] sm:$0xff pattern:$0x73625140] }
 0x1bc   : > { %379 = vrot.lane.b32.xlu1 %v375_v7, %s823_s10  ;;  %394 = vst [vmem:[#allocation1 + $0x2] ss:$4 sm:$0xff] %v337_v62  ;;  %388 = vrot.lane.b32.xlu2 %v384_v8, %s824_s9 }
 0x1c3   : > { %v397_v10 = vld.sshfl [vmem:[#allocation1 + $0x8] sm:$0xff pattern:$0x73625140]  ;;  %v395_v11 = vld.sshfl [vmem:[#allocation1] sm:$0xff pattern:$0x73625140] }
 0x1c4   : > { %401 = vrot.lane.b32.xlu1 %v397_v10, %s825_s5  ;;  %399 = vrot.lane.b32.xlu0 %v395_v11, %s825_s5  ;;  %405 = vst [vmem:[#allocation1 + $0x3] ss:$4 sm:$0xff] %v337_v62 }
 0x1c5   : > { %390 = vrot.lane.b32.xlu2 %v386_v9, %s824_s9  ;;  %s739_s9 = scalar_lea.hbm %s1078_s3, 32 }
 0x1c6   : > { %p741_p0 = scmp.lt.s32.totalorder %s739_s9, %s735_s4 }
 0x1c8   : > { %p742_p1 = por %p741_p0, %p740_p13 }
 0x1ca   : > { %p743_p2 = pnand %p742_p1, %p738_p12 }
 0x1cb   : > { %v406_v12 = vld.sshfl [vmem:[#allocation1] sm:$0xff pattern:$0x73625140]  ;;  %v408_v13 = vld.sshfl [vmem:[#allocation1 + $0x8] sm:$0xff pattern:$0x73625140] }
 0x1cc   : > { %358 = vrot.lane.b32.xlu1 %v354_v3, %s822_s28  ;;  %412 = vrot.lane.b32.xlu0 %v408_v13, %s826_s11  ;;  %415 = vst [vmem:[#allocation1] ss:$4 sm:$0xff] %v337_v62 }
 0x1cd   : > { %410 = vrot.lane.b32.xlu2 %v406_v12, %s826_s11 }
 0x1d3   : > { %v416_v14 = vld.sshfl [vmem:[#allocation1] sm:$0xff pattern:$0x73625140]  ;;  %v418_v15 = vld.sshfl [vmem:[#allocation1 + $0x8] sm:$0xff pattern:$0x73625140] }
 0x1d4   : > { %420 = vrot.lane.b32.xlu0 %v416_v14, %s827_s27 }
 0x1d5   : > { %367 = vrot.lane.b32.xlu2 %v363_v4, %s828_s24 }
 0x1dc   : > { %422 = vrot.lane.b32.xlu0 %v418_v15, %s827_s27 }
 0x1e4   : > { %369 = vrot.lane.b32.xlu0 %v365_v5, %s828_s24 }
 0x1f6   : > { %v348_v18 = vpop.permute.xlu2 %347 }
 0x20e   : > { %v346_v16 = vpop.permute.xlu1 %345 }
 0x20f   : > { %v349_v38 = vsel %vm199_vm6, %v346_v16, %v348_v18 }
 0x210   : > { %v427_v43 = vsel %vm283_vm4, %v336_v37, %v349_v38 }
 0x216   : > { %v357_v17 = vpop.permute.xlu0 %356  ;;  %v389_v21 = vpop.permute.xlu2 %388 }
 0x21f   : > { %v391_v24 = vpop.permute.xlu2 %390 }
 0x220   : > { %v392_v29 = vsel %vm246_vm1, %v389_v21, %v391_v24 }
 0x226   : > { %v378_v19 = vpop.permute.xlu1 %377 }
 0x227   : > { %v411_v27 = vpop.permute.xlu2 %410 }
 0x22e   : > { %v380_v22 = vpop.permute.xlu1 %379 }
 0x22f   : > { %v381_v28 = vsel %vm234_vm0, %v378_v19, %v380_v22  ;;  %v368_v42 = vpop.permute.xlu2 %367 }
 0x230   : > { %v435_v32 = vsel %vm283_vm4, %v381_v28, %v392_v29 }
 0x236   : > { %v400_v20 = vpop.permute.xlu0 %399  ;;  %v402_v26 = vpop.permute.xlu1 %401 }
 0x237   : > { %v403_v33 = vsel %vm258_vm3, %v400_v20, %v402_v26 }
 0x238   : > { %v437_v39 = vsel %vm287_vm7, %v435_v32, %v403_v33 }
 0x23e   : > { %v413_v23 = vpop.permute.xlu0 %412  ;;  %v359_v35 = vpop.permute.xlu1 %358 }
 0x23f   : > { %v414_v36 = vsel %vm270_vm5, %v411_v27, %v413_v23  ;;  %v360_v40 = vsel %vm211_vm8, %v357_v17, %v359_v35 }
 0x240   : > { %v439_v41 = vsel %vm290_vm9, %v437_v39, %v414_v36  ;;  %v429_v46 = vsel %vm287_vm7, %v427_v43, %v360_v40 }
 0x246   : > { %v421_v25 = vpop.permute.xlu0 %420 }
 0x24e   : > { %v423_v30 = vpop.permute.xlu0 %422 }
 0x24f   : > { %v424_v31 = vsel %vm281_vm2, %v421_v25, %v423_v30 }
 0x250   : > { %v442_v34 = vsel %vm283_vm4, %v424_v31, 0 }
 0x251   : > { %449 = vmatpush.bf16.msra.mxu1 %v442_v34 }
 0x255   : > { %450 = vmatpush.bf16.msra.mxu1 %v439_v41 }
 0x256   : > { %v370_v44 = vpop.permute.xlu0 %369 }
 0x257   : > { %v371_v45 = vsel %vm223_vm10, %v368_v42, %v370_v44 }
 0x258   : > { %v431_v47 = vsel %vm290_vm9, %v429_v46, %v371_v45 }
 0x259   : > { %451 = vmatpush.bf16.msra.mxu1 %v431_v47 }
 0x25c   : > { %574 = vmatmul.msk.bf16.vlgmr.msra.gmra.mxu1 %vm307_vm11, %v926_v0 }
 0x2d9   : > { %v453_v48 = vpop.f32.mrf.mxu1 }
 0x2da   : > { %v454_v49 = vadd.f32 %v453_v48, %v990_v52 }
 0x2dc   : > { %v457_v50 = vmul.f32 0.5, %v454_v49 }
 0x2de   : > { %669 = vtanh.f32 %v457_v50 }
 0x2e1   : > { %v455_v51 = vpop.f32.mrf.mxu1 }
 0x2e4   : > { %v670_v53 = vpop.eup %669 }
 0x2e5   : > { %v459_v54 = vmul.f32 0.5, %v670_v53 }
 0x2e7   : > { %v460_v0 = vadd.f32 0.5, %v459_v54 }
 0x2e9   : > { %v461_v52 = vmul.f32 %v460_v0, %v454_v49 }
 0x2eb   : > { %v462_v55 = vpack.c.bf16 %v461_v52, %v461_v52 }
 0x2ed   : > { %463 = vst [vmem:[%s954_s22 + $0x4] sm:$0xf] %v462_v55 }
 0x2ee   : > { %746 = shalt.err (!%p743_p2)
}
 0x2ef   : > { %583 = dma.vmem_to_hbm [thread:$0]  (%p901_p3), %s481_s7, 128, %s483_s8, %s465_s16  }
 0x2f0 PF: > { %p589_p4 = scmp.ge.s32.totalorder %s817_s19, 2  ;;  %s494_s22 = sand.u32 1, %s789_s12  }
 0x2f1   : > { %s495_s27 = scalar_lea.sflag [#allocation5], %s494_s22 }
 0x2f2   : > { %p586_p5 = pnand %p589_p4, %p910_p8 }
 0x2f4   : > { %p587_p6 = pneg %p586_p5 }
 0x2f6   : > { %784 = dma.done.wait (%p587_p6), %s495_s27, 128  }
 0x2f7   : > { %786 = vsyncadd (%p587_p6), %s495_s27, 4294967168  ;;  %s16_s19 = sadd.s32 1, %s817_s19   ;;  %s1093_s16 = sld [smem:[#allocation15_spill]] }
 0x2f8   : > { %p13_p7 = scmp.ge.s32.totalorder %s16_s19, 6   ;;  %s1094_s25 = sld [smem:[#allocation16_spill]] }
 0x2f9   : > { %s1095_s18 = sld [smem:[#allocation17_spill]]  ;;  %s1096_s12 = smov %s793_s13 }
 0x2fa   : > { %s1097_s13 = smov %s797_s14  ;;  %s1098_s14 = smov %s919_s30 }
 0x2fb   : > { %s1099_s15 = smov %s809_s17  ;;  %15 = sbr.rel (!%p13_p7) target bundleno = 8 (0x8), region = 85 }
 0x2fe   : > { %s1100_s17 = smov %s1094_s25 }
 0x300   :  { %501 = vsyncpa [#allocation5], 1 }
 0x301   :  { %503 = vsyncpa [#allocation5 + $0x1], 1 }
 0x302   :  { %504 = vsyncmov [#allocation3] }
 0x305   :  { %s505_s26 = vpop.sfrf %504 }
 0x306   :  { %p581_p3 = scmp.ne.s32.totalorder %s505_s26, 0 }
 0x308   :  { %509 = shalt.err (%p581_p3)  }
 0x309   :  { %511 = vsyncmov [#allocation3 + $0x1] }
 0x30c   :  { %s512_s24 = vpop.sfrf %511 }
 0x30d   :  { %p582_p8 = scmp.ne.s32.totalorder %s512_s24, 0 }
 0x30f   :  { %516 = shalt.err (%p582_p8)  }

</bundles_post_ra>
